<compile_context>
chip_gen: v6e
topology: v6e:2x2x1
jax: 0.10.0
libtpu: 0.0.40
codegen_flags: <defaults>
</compile_context>

<pallas_src>
import functools

import jax
import jax.numpy as jnp
import numpy as np
from jax.experimental import pallas as pl
from jax.experimental.pallas import tpu as pltpu


def _round_up(x, m):
    return (x + m - 1) // m * m


def _tpu_config():
    """Best-effort (physical VMEM bytes, MXU lane alignment, is_v7x) with safe fallbacks."""
    kind = ""
    try:
        kind = jax.devices()[0].device_kind.lower()
    except Exception:
        pass
    is_v7x = "v7" in kind
    try:
        vmem_phys = int(pltpu.get_tpu_info().vmem_capacity_bytes)
    except Exception:
        vmem_phys = (64 << 20) if is_v7x else (128 << 20)
    lane_align = 256 if ("v6" in kind or is_v7x) else 128   # v6e/v7x MXUs are 256 wide
    return vmem_phys, lane_align, is_v7x


def fused_mlp_ce_kernel(x_ref, wfc_ref, bfc_ref, wcls_ref, bcls_ref, lbl_ref,
                        logits_ref, loss_ref, *, num_class, num_cat, batch, tile_m):
    """relu(fc(relu(fc(x)))) -> cls, plus fused per-tile cross-entropy partial sum.

    Per grid step:
      x_ref      [TM, Dp]  f32 (cast to bf16 in-kernel)
      wfc_ref    [Dp, Dp]  bf16  (resident, single-buffered, shared by both fc passes)
      bfc_ref    [1, Dp]   f32
      wcls_ref   [Dp, Cp]  bf16  (resident, single-buffered)
      bcls_ref   [1, Cp]   f32
      lbl_ref    [TM, num_class] int32
      logits_ref [TM, Cp]  bf16
      loss_ref   [8, 128]  f32   (tile partial-sum broadcast over the whole block)
    """
    w_fc = wfc_ref[...]                        # bf16, VMEM resident, used twice
    b_fc = bfc_ref[...]                        # f32

    # --- MLP: two relu(fc(.)) passes with the SHARED fc weight, then cls -----------
    x = x_ref[...].astype(jnp.bfloat16)        # f32 in HBM; cast on VPU under MXU slack
    h = jnp.dot(x, w_fc, preferred_element_type=jnp.float32) + b_fc
    h = jnp.maximum(h, 0.0)
    h = jnp.dot(h.astype(jnp.bfloat16), w_fc, preferred_element_type=jnp.float32) + b_fc
    h = jnp.maximum(h, 0.0)
    logits = (jnp.dot(h.astype(jnp.bfloat16), wcls_ref[...],
                      preferred_element_type=jnp.float32) + bcls_ref[...])
    logits_ref[...] = logits.astype(logits_ref.dtype)       # bf16 lane-dense writeback

    # --- fused cross-entropy over groups of num_cat lanes ---------------------------
    # Row b holds num_class groups of num_cat consecutive lanes; cols >= C are zero
    # padding and never selected (every group lies fully inside the real C columns).
    tm, cp = logits.shape
    col = jax.lax.broadcasted_iota(jnp.int32, (tm, cp), 1)
    lbl = lbl_ref[...]                                       # [TM, num_class] int32
    per_row = jnp.zeros((tm, 1), jnp.float32)
    for g in range(num_class):                               # static, small
        lo = g * num_cat
        gmask = (col >= lo) & (col < lo + num_cat)
        masked = jnp.where(gmask, logits, -jnp.inf)
        m = jnp.max(masked, axis=-1, keepdims=True)                  # [TM, 1]
        e = jnp.exp(masked - m)                                      # exp(-inf)=0 off-group
        lse = m + jnp.log(jnp.sum(e, axis=-1, keepdims=True))        # per-group logsumexp
        tgt = lo + lbl[:, g:g + 1]                                   # target column per row
        picked = jnp.sum(jnp.where(col == tgt, logits, 0.0),
                         axis=-1, keepdims=True)
        per_row = per_row + (lse - picked)

    # mask padded batch rows, emit the tile partial sum (dense (8,128) block)
    row_ids = (pl.program_id(0) * tile_m
               + jax.lax.broadcasted_iota(jnp.int32, (tm, 1), 0))
    valid = row_ids < batch
    tile_sum = jnp.sum(jnp.where(valid, per_row, 0.0), axis=0, keepdims=True)  # (1,1)
    loss_ref[...] = jnp.broadcast_to(tile_sum, loss_ref.shape)


def prepare_pn_params(w_fc, b_fc, w_cls, b_cls, num_cat):
    """Pad + cast the weights ONCE (hoisted out of the per-call forward path)."""
    D = w_fc.shape[0]
    C = w_cls.shape[1]
    assert w_fc.shape == (D, D) and w_cls.shape[0] == D
    assert C % num_cat == 0, "cls output dim must equal num_class * num_cat"
    num_class = C // num_cat

    vmem_phys, lane_align, is_v7x = _tpu_config()
    Dp = _round_up(D, lane_align)
    Cp = _round_up(C, 128)

    wfc_p = jnp.pad(w_fc.astype(jnp.bfloat16), ((0, Dp - D), (0, Dp - D)))
    bfc_p = jnp.pad(b_fc.astype(jnp.float32).reshape(1, D), ((0, 0), (0, Dp - D)))
    wcls_p = jnp.pad(w_cls.astype(jnp.bfloat16), ((0, Dp - D), (0, Cp - C)))
    bcls_p = jnp.pad(b_cls.astype(jnp.float32).reshape(1, C), ((0, 0), (0, Cp - C)))

    return dict(wfc=wfc_p, bfc=bfc_p, wcls=wcls_p, bcls=bcls_p,
                D=D, C=C, Dp=Dp, Cp=Cp, num_class=num_class, num_cat=num_cat,
                vmem_phys=vmem_phys, is_v7x=is_v7x)


def pn_classifier_forward(img_embeddings, img_label, prepared):
    """Mirrors PN_classifier.forward(img_embeddings, img_label, return_loss=True)."""
    D, C = prepared["D"], prepared["C"]
    Dp, Cp = prepared["Dp"], prepared["Cp"]
    num_class, num_cat = prepared["num_class"], prepared["num_cat"]
    vmem_phys, is_v7x = prepared["vmem_phys"], prepared["is_v7x"]

    B = img_embeddings.shape[0]
    x = img_embeddings.reshape(B, -1).astype(jnp.float32)    # .view(num_batch, -1), f32
    assert x.shape[1] == D

    # --- batch tiling: TM multiple of 16; keep both v7x TensorCores busy ------------
    tm_cap = 256 if is_v7x else 512
    if B <= 128:
        TM = _round_up(max(B, 8), 16)
    elif is_v7x and B <= 2 * tm_cap:
        TM = _round_up((B + 1) // 2, 16)        # >= 2 grid tiles -> both TCs busy
    else:
        TM = min(tm_cap, _round_up(B, 16))
    Bp = _round_up(B, TM)
    n_tiles = Bp // TM

    if (Bp, Dp) != (B, D):
        x = jnp.pad(x, ((0, Bp - B), (0, Dp - D)))
    lbl = img_label.reshape(B, -1).astype(jnp.int32)
    if Bp != B:
        lbl = jnp.pad(lbl, ((0, Bp - B), (0, 0)))

    # --- VMEM budget: resident weights single-buffered, tiles double-buffered -------
    bytes_resident = Dp * Dp * 2 + Dp * Cp * 2 + Dp * 4 + Cp * 4
    bytes_tiles = 2 * (TM * Dp * 4 + TM * Cp * 2 + TM * num_class * 4 + 8 * 128 * 4)
    bytes_interm = TM * Dp * 4 * 2 + TM * Cp * 4 * 4          # f32 h / logits / masks
    est = bytes_resident + bytes_tiles + bytes_interm + (4 << 20)
    vmem_limit = int(min(max(est, 32 << 20), vmem_phys - (2 << 20)))

    kernel = functools.partial(fused_mlp_ce_kernel, num_class=num_class,
                               num_cat=num_cat, batch=B, tile_m=TM)

    def build(single_buffer_weights):
        def resident(shape):
            if single_buffer_weights and hasattr(pl, "Buffered"):
                return pl.BlockSpec(shape, lambda i: (0, 0),
                                    pipeline_mode=pl.Buffered(1))
            return pl.BlockSpec(shape, lambda i: (0, 0))

        return pl.pallas_call(
            kernel,
            out_shape=(
                jax.ShapeDtypeStruct((Bp, Cp), jnp.bfloat16),        # padded logits
                jax.ShapeDtypeStruct((n_tiles * 8, 128), jnp.float32),  # loss partials
            ),
            grid_spec=pltpu.PrefetchScalarGridSpec(
                num_scalar_prefetch=0,
                grid=(n_tiles,),
                in_specs=[
                    pl.BlockSpec((TM, Dp), lambda i: (i, 0)),          # x tile (f32)
                    resident((Dp, Dp)),                                # w_fc (resident)
                    resident((1, Dp)),                                 # b_fc
                    resident((Dp, Cp)),                                # w_cls (resident)
                    resident((1, Cp)),                                 # b_cls
                    pl.BlockSpec((TM, num_class), lambda i: (i, 0)),   # labels tile
                ],
                out_specs=(
                    pl.BlockSpec((TM, Cp), lambda i: (i, 0)),          # padded logits
                    pl.BlockSpec((8, 128), lambda i: (i, 0)),          # per-tile loss sum
                ),
            ),
            compiler_params=pltpu.CompilerParams(
                dimension_semantics=("parallel",),
                vmem_limit_bytes=vmem_limit,
            ),
        )

    args = (x, prepared["wfc"], prepared["bfc"], prepared["wcls"], prepared["bcls"], lbl)
    try:
        logits_p, loss_parts = build(True)(*args)
    except Exception:
        # Fallback: default (double-buffered) resident specs if Buffered(1) is rejected.
        logits_p, loss_parts = build(False)(*args)

    logits = logits_p[:B, :C].astype(jnp.float32)
    loss = jnp.sum(loss_parts[0::8, 0]) / (B * num_class)     # mean over N = B*num_class
    return {"logits": logits, "loss_value": loss}


def init_params(key, num_class, input_dim, num_cat):
    """Deterministic init mimicking torch.nn.Linear defaults: U(-1/sqrt(fan_in), +)."""
    D = num_class * input_dim
    C = num_class * num_cat
    k_fc_w, k_fc_b, k_cls_w, k_cls_b = jax.random.split(key, 4)
    bnd = 1.0 / jnp.sqrt(D)
    w_fc = jax.random.uniform(k_fc_w, (D, D), jnp.float32, -bnd, bnd)
    b_fc = jax.random.uniform(k_fc_b, (D,), jnp.float32, -bnd, bnd)
    w_cls = jax.random.uniform(k_cls_w, (D, C), jnp.float32, -bnd, bnd)
    b_cls = jax.random.uniform(k_cls_b, (C,), jnp.float32, -bnd, bnd)
    return w_fc, b_fc, w_cls, b_cls


if __name__ == "__main__":
    # Small shapes consistent with the module: B=2, num_class=4, input_dim=32, num_cat=3
    B, num_class, input_dim, num_cat = 2, 4, 32, 3

    key = jax.random.PRNGKey(0)
    k_emb, k_lbl, k_par = jax.random.split(key, 3)

    img_embeddings = jax.random.normal(k_emb, (B, num_class, input_dim), jnp.float32)
    img_label = jax.random.randint(k_lbl, (B, num_class), 0, num_cat)   # multiclass labels
    params = init_params(k_par, num_class, input_dim, num_cat)

    # Padding/casting hoisted out of the forward path: done once here, reused per call.
    prepared = prepare_pn_params(*params, num_cat=num_cat)

    outputs = pn_classifier_forward(img_embeddings, img_label, prepared)
    jax.block_until_ready(outputs["logits"])
    jax.block_until_ready(outputs["loss_value"])

    assert outputs["logits"].shape == (B, num_class * num_cat)
    assert outputs["loss_value"].shape == ()

    # Pure-JAX f32 reference; loose tolerance for bf16 weights / MXU f32 accumulation.
    w_fc, b_fc, w_cls, b_cls = params
    x_ref = img_embeddings.reshape(B, -1)
    h_ref = jax.nn.relu(x_ref @ w_fc + b_fc)
    h_ref = jax.nn.relu(h_ref @ w_fc + b_fc)
    ref_logits = h_ref @ w_cls + b_cls
    logp = jax.nn.log_softmax(ref_logits.reshape(-1, num_cat), axis=-1)
    ref_loss = -jnp.mean(jnp.take_along_axis(logp, img_label.reshape(-1, 1), axis=-1))
    np.testing.assert_allclose(np.asarray(outputs["logits"]), np.asarray(ref_logits),
                               rtol=1e-1, atol=1e-1)
    np.testing.assert_allclose(float(outputs["loss_value"]), float(ref_loss),
                               rtol=5e-2, atol=5e-2)

    print("KERNEL_OK")
</pallas_src>

<mosaic_0001>
module attributes {stable_mosaic.version = 11 : i64} {
  func.func @fused_mlp_ce_kernel(%arg0: i32, %arg1: memref<16x128xf32, #tpu.memory_space<vmem>>, %arg2: memref<128x128xbf16, #tpu.memory_space<vmem>>, %arg3: memref<1x128xf32, #tpu.memory_space<vmem>>, %arg4: memref<128x128xbf16, #tpu.memory_space<vmem>>, %arg5: memref<1x128xf32, #tpu.memory_space<vmem>>, %arg6: memref<16x4xi32, #tpu.memory_space<vmem>>, %arg7: memref<16x128xbf16, #tpu.memory_space<vmem>>, %arg8: memref<8x128xf32, #tpu.memory_space<vmem>>) attributes {dimension_semantics = [#tpu.dimension_semantics<parallel>], iteration_bounds = array<i64: 1>, scalar_prefetch = 0 : i64, scratch_operands = 0 : i64, tpu.core_type = #tpu.core_type<tc>, window_params = [{transform_indices = @transform_0, window_bounds = array<i64: 16, 128>}, {pipeline_mode = #tpu.pipeline_mode<synchronous>, transform_indices = @transform_1, window_bounds = array<i64: 128, 128>}, {pipeline_mode = #tpu.pipeline_mode<synchronous>, transform_indices = @transform_2, window_bounds = array<i64: 1, 128>}, {pipeline_mode = #tpu.pipeline_mode<synchronous>, transform_indices = @transform_3, window_bounds = array<i64: 128, 128>}, {pipeline_mode = #tpu.pipeline_mode<synchronous>, transform_indices = @transform_4, window_bounds = array<i64: 1, 128>}, {transform_indices = @transform_5, window_bounds = array<i64: 16, 4>}, {transform_indices = @transform_6, window_bounds = array<i64: 16, 128>}, {transform_indices = @transform_7, window_bounds = array<i64: 8, 128>}]} {
    %c0 = arith.constant 0 : index
    %c0_0 = arith.constant 0 : index
    %0 = vector.load %arg2[%c0, %c0_0] : memref<128x128xbf16, #tpu.memory_space<vmem>>, vector<128x128xbf16>
    %c0_1 = arith.constant 0 : index
    %c0_2 = arith.constant 0 : index
    %1 = vector.load %arg3[%c0_1, %c0_2] : memref<1x128xf32, #tpu.memory_space<vmem>>, vector<1x128xf32>
    %c0_3 = arith.constant 0 : index
    %c0_4 = arith.constant 0 : index
    %2 = vector.load %arg1[%c0_3, %c0_4] : memref<16x128xf32, #tpu.memory_space<vmem>>, vector<16x128xf32>
    %3 = arith.truncf %2 : vector<16x128xf32> to vector<16x128xbf16>
    %cst = arith.constant dense<0.000000e+00> : vector<16x128xf32>
    %4 = tpu.matmul %3, %0, %cst {dimension_numbers = #tpu.dot_dimension_numbers<[1], [0], [0], [1], [0, 0, 1, 1], [], []>} : vector<16x128xbf16>, vector<128x128xbf16>, vector<16x128xf32> -> vector<16x128xf32>
    %5 = vector.broadcast %1 : vector<1x128xf32> to vector<16x128xf32>
    %6 = arith.addf %4, %5 : vector<16x128xf32>
    %cst_5 = arith.constant 0.000000e+00 : f32
    %7 = vector.broadcast %cst_5 : f32 to vector<16x128xf32>
    %8 = arith.maximumf %6, %7 : vector<16x128xf32>
    %9 = arith.truncf %8 : vector<16x128xf32> to vector<16x128xbf16>
    %cst_6 = arith.constant dense<0.000000e+00> : vector<16x128xf32>
    %10 = tpu.matmul %9, %0, %cst_6 {dimension_numbers = #tpu.dot_dimension_numbers<[1], [0], [0], [1], [0, 0, 1, 1], [], []>} : vector<16x128xbf16>, vector<128x128xbf16>, vector<16x128xf32> -> vector<16x128xf32>
    %11 = vector.broadcast %1 : vector<1x128xf32> to vector<16x128xf32>
    %12 = arith.addf %10, %11 : vector<16x128xf32>
    %cst_7 = arith.constant 0.000000e+00 : f32
    %13 = vector.broadcast %cst_7 : f32 to vector<16x128xf32>
    %14 = arith.maximumf %12, %13 : vector<16x128xf32>
    %15 = arith.truncf %14 : vector<16x128xf32> to vector<16x128xbf16>
    %c0_8 = arith.constant 0 : index
    %c0_9 = arith.constant 0 : index
    %16 = vector.load %arg4[%c0_8, %c0_9] : memref<128x128xbf16, #tpu.memory_space<vmem>>, vector<128x128xbf16>
    %cst_10 = arith.constant dense<0.000000e+00> : vector<16x128xf32>
    %17 = tpu.matmul %15, %16, %cst_10 {dimension_numbers = #tpu.dot_dimension_numbers<[1], [0], [0], [1], [0, 0, 1, 1], [], []>} : vector<16x128xbf16>, vector<128x128xbf16>, vector<16x128xf32> -> vector<16x128xf32>
    %c0_11 = arith.constant 0 : index
    %c0_12 = arith.constant 0 : index
    %18 = vector.load %arg5[%c0_11, %c0_12] : memref<1x128xf32, #tpu.memory_space<vmem>>, vector<1x128xf32>
    %19 = vector.broadcast %18 : vector<1x128xf32> to vector<16x128xf32>
    %20 = arith.addf %17, %19 : vector<16x128xf32>
    %21 = arith.truncf %20 : vector<16x128xf32> to vector<16x128xbf16>
    %c0_13 = arith.constant 0 : index
    %c0_14 = arith.constant 0 : index
    %22 = vector.load %arg7[%c0_13, %c0_14] : memref<16x128xbf16, #tpu.memory_space<vmem>>, vector<16x128xbf16>
    tpu.vector_store %arg7[%c0_13, %c0_14], %21 {strides = array<i32>} : memref<16x128xbf16, #tpu.memory_space<vmem>>, vector<16x128xbf16>,
    %23 = tpu.iota {dimensions = array<i32: 1>} : vector<16x128xi32>
    %c0_15 = arith.constant 0 : index
    %c0_16 = arith.constant 0 : index
    %24 = vector.load %arg6[%c0_15, %c0_16] : memref<16x4xi32, #tpu.memory_space<vmem>>, vector<16x4xi32>
    %cst_17 = arith.constant 0.000000e+00 : f32
    %25 = vector.broadcast %cst_17 : f32 to vector<16x1xf32>
    %c0_i32 = arith.constant 0 : i32
    %26 = vector.broadcast %c0_i32 : i32 to vector<16x128xi32>
    %27 = arith.cmpi sge, %23, %26 : vector<16x128xi32>
    %c3_i32 = arith.constant 3 : i32
    %28 = vector.broadcast %c3_i32 : i32 to vector<16x128xi32>
    %29 = arith.cmpi slt, %23, %28 : vector<16x128xi32>
    %30 = arith.andi %27, %29 : vector<16x128xi1>
    %cst_18 = arith.constant 0xFF800000 : f32
    %31 = vector.broadcast %cst_18 : f32 to vector<16x128xf32>
    %32 = arith.select %30, %20, %31 : vector<16x128xi1>, vector<16x128xf32>
    %cst_19 = arith.constant dense<0xFF800000> : vector<16xf32>
    %33 = vector.multi_reduction <maximumf>, %32, %cst_19 [1] : vector<16x128xf32> to vector<16xf32>
    %34 = vector.shape_cast %33 : vector<16xf32> to vector<16x1xf32>
    %35 = vector.broadcast %34 : vector<16x1xf32> to vector<16x128xf32>
    %36 = arith.subf %32, %35 : vector<16x128xf32>
    %37 = math.exp %36 : vector<16x128xf32>
    %cst_20 = arith.constant dense<0.000000e+00> : vector<16xf32>
    %38 = vector.multi_reduction <add>, %37, %cst_20 [1] : vector<16x128xf32> to vector<16xf32>
    %39 = vector.shape_cast %38 : vector<16xf32> to vector<16x1xf32>
    %40 = math.log %39 : vector<16x1xf32>
    %41 = arith.addf %34, %40 : vector<16x1xf32>
    %42 = vector.extract_strided_slice %24 {offsets = [0, 0], sizes = [16, 1], strides = [1, 1]} : vector<16x4xi32> to vector<16x1xi32>
    %c0_i32_21 = arith.constant 0 : i32
    %43 = vector.broadcast %c0_i32_21 : i32 to vector<16x1xi32>
    %44 = arith.addi %43, %42 : vector<16x1xi32>
    %45 = vector.broadcast %44 : vector<16x1xi32> to vector<16x128xi32>
    %46 = arith.cmpi eq, %23, %45 : vector<16x128xi32>
    %cst_22 = arith.constant 0.000000e+00 : f32
    %47 = vector.broadcast %cst_22 : f32 to vector<16x128xf32>
    %48 = arith.select %46, %20, %47 : vector<16x128xi1>, vector<16x128xf32>
    %cst_23 = arith.constant dense<0.000000e+00> : vector<16xf32>
    %49 = vector.multi_reduction <add>, %48, %cst_23 [1] : vector<16x128xf32> to vector<16xf32>
    %50 = vector.shape_cast %49 : vector<16xf32> to vector<16x1xf32>
    %51 = arith.subf %41, %50 : vector<16x1xf32>
    %52 = arith.addf %25, %51 : vector<16x1xf32>
    %c3_i32_24 = arith.constant 3 : i32
    %53 = vector.broadcast %c3_i32_24 : i32 to vector<16x128xi32>
    %54 = arith.cmpi sge, %23, %53 : vector<16x128xi32>
    %c6_i32 = arith.constant 6 : i32
    %55 = vector.broadcast %c6_i32 : i32 to vector<16x128xi32>
    %56 = arith.cmpi slt, %23, %55 : vector<16x128xi32>
    %57 = arith.andi %54, %56 : vector<16x128xi1>
    %cst_25 = arith.constant 0xFF800000 : f32
    %58 = vector.broadcast %cst_25 : f32 to vector<16x128xf32>
    %59 = arith.select %57, %20, %58 : vector<16x128xi1>, vector<16x128xf32>
    %cst_26 = arith.constant dense<0xFF800000> : vector<16xf32>
    %60 = vector.multi_reduction <maximumf>, %59, %cst_26 [1] : vector<16x128xf32> to vector<16xf32>
    %61 = vector.shape_cast %60 : vector<16xf32> to vector<16x1xf32>
    %62 = vector.broadcast %61 : vector<16x1xf32> to vector<16x128xf32>
    %63 = arith.subf %59, %62 : vector<16x128xf32>
    %64 = math.exp %63 : vector<16x128xf32>
    %cst_27 = arith.constant dense<0.000000e+00> : vector<16xf32>
    %65 = vector.multi_reduction <add>, %64, %cst_27 [1] : vector<16x128xf32> to vector<16xf32>
    %66 = vector.shape_cast %65 : vector<16xf32> to vector<16x1xf32>
    %67 = math.log %66 : vector<16x1xf32>
    %68 = arith.addf %61, %67 : vector<16x1xf32>
    %69 = vector.extract_strided_slice %24 {offsets = [0, 1], sizes = [16, 1], strides = [1, 1]} : vector<16x4xi32> to vector<16x1xi32>
    %c3_i32_28 = arith.constant 3 : i32
    %70 = vector.broadcast %c3_i32_28 : i32 to vector<16x1xi32>
    %71 = arith.addi %70, %69 : vector<16x1xi32>
    %72 = vector.broadcast %71 : vector<16x1xi32> to vector<16x128xi32>
    %73 = arith.cmpi eq, %23, %72 : vector<16x128xi32>
    %cst_29 = arith.constant 0.000000e+00 : f32
    %74 = vector.broadcast %cst_29 : f32 to vector<16x128xf32>
    %75 = arith.select %73, %20, %74 : vector<16x128xi1>, vector<16x128xf32>
    %cst_30 = arith.constant dense<0.000000e+00> : vector<16xf32>
    %76 = vector.multi_reduction <add>, %75, %cst_30 [1] : vector<16x128xf32> to vector<16xf32>
    %77 = vector.shape_cast %76 : vector<16xf32> to vector<16x1xf32>
    %78 = arith.subf %68, %77 : vector<16x1xf32>
    %79 = arith.addf %52, %78 : vector<16x1xf32>
    %c6_i32_31 = arith.constant 6 : i32
    %80 = vector.broadcast %c6_i32_31 : i32 to vector<16x128xi32>
    %81 = arith.cmpi sge, %23, %80 : vector<16x128xi32>
    %c9_i32 = arith.constant 9 : i32
    %82 = vector.broadcast %c9_i32 : i32 to vector<16x128xi32>
    %83 = arith.cmpi slt, %23, %82 : vector<16x128xi32>
    %84 = arith.andi %81, %83 : vector<16x128xi1>
    %cst_32 = arith.constant 0xFF800000 : f32
    %85 = vector.broadcast %cst_32 : f32 to vector<16x128xf32>
    %86 = arith.select %84, %20, %85 : vector<16x128xi1>, vector<16x128xf32>
    %cst_33 = arith.constant dense<0xFF800000> : vector<16xf32>
    %87 = vector.multi_reduction <maximumf>, %86, %cst_33 [1] : vector<16x128xf32> to vector<16xf32>
    %88 = vector.shape_cast %87 : vector<16xf32> to vector<16x1xf32>
    %89 = vector.broadcast %88 : vector<16x1xf32> to vector<16x128xf32>
    %90 = arith.subf %86, %89 : vector<16x128xf32>
    %91 = math.exp %90 : vector<16x128xf32>
    %cst_34 = arith.constant dense<0.000000e+00> : vector<16xf32>
    %92 = vector.multi_reduction <add>, %91, %cst_34 [1] : vector<16x128xf32> to vector<16xf32>
    %93 = vector.shape_cast %92 : vector<16xf32> to vector<16x1xf32>
    %94 = math.log %93 : vector<16x1xf32>
    %95 = arith.addf %88, %94 : vector<16x1xf32>
    %96 = vector.extract_strided_slice %24 {offsets = [0, 2], sizes = [16, 1], strides = [1, 1]} : vector<16x4xi32> to vector<16x1xi32>
    %c6_i32_35 = arith.constant 6 : i32
    %97 = vector.broadcast %c6_i32_35 : i32 to vector<16x1xi32>
    %98 = arith.addi %97, %96 : vector<16x1xi32>
    %99 = vector.broadcast %98 : vector<16x1xi32> to vector<16x128xi32>
    %100 = arith.cmpi eq, %23, %99 : vector<16x128xi32>
    %cst_36 = arith.constant 0.000000e+00 : f32
    %101 = vector.broadcast %cst_36 : f32 to vector<16x128xf32>
    %102 = arith.select %100, %20, %101 : vector<16x128xi1>, vector<16x128xf32>
    %cst_37 = arith.constant dense<0.000000e+00> : vector<16xf32>
    %103 = vector.multi_reduction <add>, %102, %cst_37 [1] : vector<16x128xf32> to vector<16xf32>
    %104 = vector.shape_cast %103 : vector<16xf32> to vector<16x1xf32>
    %105 = arith.subf %95, %104 : vector<16x1xf32>
    %106 = arith.addf %79, %105 : vector<16x1xf32>
    %c9_i32_38 = arith.constant 9 : i32
    %107 = vector.broadcast %c9_i32_38 : i32 to vector<16x128xi32>
    %108 = arith.cmpi sge, %23, %107 : vector<16x128xi32>
    %c12_i32 = arith.constant 12 : i32
    %109 = vector.broadcast %c12_i32 : i32 to vector<16x128xi32>
    %110 = arith.cmpi slt, %23, %109 : vector<16x128xi32>
    %111 = arith.andi %108, %110 : vector<16x128xi1>
    %cst_39 = arith.constant 0xFF800000 : f32
    %112 = vector.broadcast %cst_39 : f32 to vector<16x128xf32>
    %113 = arith.select %111, %20, %112 : vector<16x128xi1>, vector<16x128xf32>
    %cst_40 = arith.constant dense<0xFF800000> : vector<16xf32>
    %114 = vector.multi_reduction <maximumf>, %113, %cst_40 [1] : vector<16x128xf32> to vector<16xf32>
    %115 = vector.shape_cast %114 : vector<16xf32> to vector<16x1xf32>
    %116 = vector.broadcast %115 : vector<16x1xf32> to vector<16x128xf32>
    %117 = arith.subf %113, %116 : vector<16x128xf32>
    %118 = math.exp %117 : vector<16x128xf32>
    %cst_41 = arith.constant dense<0.000000e+00> : vector<16xf32>
    %119 = vector.multi_reduction <add>, %118, %cst_41 [1] : vector<16x128xf32> to vector<16xf32>
    %120 = vector.shape_cast %119 : vector<16xf32> to vector<16x1xf32>
    %121 = math.log %120 : vector<16x1xf32>
    %122 = arith.addf %115, %121 : vector<16x1xf32>
    %123 = vector.extract_strided_slice %24 {offsets = [0, 3], sizes = [16, 1], strides = [1, 1]} : vector<16x4xi32> to vector<16x1xi32>
    %c9_i32_42 = arith.constant 9 : i32
    %124 = vector.broadcast %c9_i32_42 : i32 to vector<16x1xi32>
    %125 = arith.addi %124, %123 : vector<16x1xi32>
    %126 = vector.broadcast %125 : vector<16x1xi32> to vector<16x128xi32>
    %127 = arith.cmpi eq, %23, %126 : vector<16x128xi32>
    %cst_43 = arith.constant 0.000000e+00 : f32
    %128 = vector.broadcast %cst_43 : f32 to vector<16x128xf32>
    %129 = arith.select %127, %20, %128 : vector<16x128xi1>, vector<16x128xf32>
    %cst_44 = arith.constant dense<0.000000e+00> : vector<16xf32>
    %130 = vector.multi_reduction <add>, %129, %cst_44 [1] : vector<16x128xf32> to vector<16xf32>
    %131 = vector.shape_cast %130 : vector<16xf32> to vector<16x1xf32>
    %132 = arith.subf %122, %131 : vector<16x1xf32>
    %133 = arith.addf %106, %132 : vector<16x1xf32>
    %c16_i32 = arith.constant 16 : i32
    %134 = arith.muli %arg0, %c16_i32 : i32
    %135 = tpu.iota {dimensions = array<i32: 0>} : vector<16x1xi32>
    %136 = vector.broadcast %134 : i32 to vector<16x1xi32>
    %137 = arith.addi %136, %135 : vector<16x1xi32>
    %c2_i32 = arith.constant 2 : i32
    %138 = vector.broadcast %c2_i32 : i32 to vector<16x1xi32>
    %139 = arith.cmpi slt, %137, %138 : vector<16x1xi32>
    %cst_45 = arith.constant 0.000000e+00 : f32
    %140 = vector.broadcast %cst_45 : f32 to vector<16x1xf32>
    %141 = arith.select %139, %133, %140 : vector<16x1xi1>, vector<16x1xf32>
    %cst_46 = arith.constant dense<0.000000e+00> : vector<1xf32>
    %142 = vector.multi_reduction <add>, %141, %cst_46 [0] : vector<16x1xf32> to vector<1xf32>
    %143 = vector.shape_cast %142 : vector<1xf32> to vector<1x1xf32>
    %144 = vector.shape_cast %143 : vector<1x1xf32> to vector<1x1xf32>
    %145 = vector.broadcast %144 : vector<1x1xf32> to vector<8x128xf32>
    %c0_47 = arith.constant 0 : index
    %c0_48 = arith.constant 0 : index
    %146 = vector.load %arg8[%c0_47, %c0_48] : memref<8x128xf32, #tpu.memory_space<vmem>>, vector<8x128xf32>
    tpu.vector_store %arg8[%c0_47, %c0_48], %145 {strides = array<i32>} : memref<8x128xf32, #tpu.memory_space<vmem>>, vector<8x128xf32>,
    return
  }
  func.func @transform_0(%arg0: i32) -> (i32, i32) {
    %c0_i32 = arith.constant 0 : i32
    %c0_i32_0 = arith.constant 0 : i32
    return %arg0, %c0_i32 : i32, i32
  }
  func.func @transform_1(%arg0: i32) -> (i32, i32) {
    %c0_i32 = arith.constant 0 : i32
    %c0_i32_0 = arith.constant 0 : i32
    %c0_i32_1 = arith.constant 0 : i32
    return %c0_i32, %c0_i32_0 : i32, i32
  }
  func.func @transform_2(%arg0: i32) -> (i32, i32) {
    %c0_i32 = arith.constant 0 : i32
    %c0_i32_0 = arith.constant 0 : i32
    %c0_i32_1 = arith.constant 0 : i32
    return %c0_i32, %c0_i32_0 : i32, i32
  }
  func.func @transform_3(%arg0: i32) -> (i32, i32) {
    %c0_i32 = arith.constant 0 : i32
    %c0_i32_0 = arith.constant 0 : i32
    %c0_i32_1 = arith.constant 0 : i32
    return %c0_i32, %c0_i32_0 : i32, i32
  }
  func.func @transform_4(%arg0: i32) -> (i32, i32) {
    %c0_i32 = arith.constant 0 : i32
    %c0_i32_0 = arith.constant 0 : i32
    %c0_i32_1 = arith.constant 0 : i32
    return %c0_i32, %c0_i32_0 : i32, i32
  }
  func.func @transform_5(%arg0: i32) -> (i32, i32) {
    %c0_i32 = arith.constant 0 : i32
    %c0_i32_0 = arith.constant 0 : i32
    return %arg0, %c0_i32 : i32, i32
  }
  func.func @transform_6(%arg0: i32) -> (i32, i32) {
    %c0_i32 = arith.constant 0 : i32
    %c0_i32_0 = arith.constant 0 : i32
    return %arg0, %c0_i32 : i32, i32
  }
  func.func @transform_7(%arg0: i32) -> (i32, i32) {
    %c0_i32 = arith.constant 0 : i32
    %c0_i32_0 = arith.constant 0 : i32
    return %arg0, %c0_i32 : i32, i32
  }
}

module attributes {stable_mosaic.version = 11 : i64} {
  func.func @fused_mlp_ce_kernel(%arg0: i32, %arg1: memref<16x128xf32, #tpu.memory_space<vmem>>, %arg2: memref<128x128xbf16, #tpu.memory_space<vmem>>, %arg3: memref<1x128xf32, #tpu.memory_space<vmem>>, %arg4: memref<128x128xbf16, #tpu.memory_space<vmem>>, %arg5: memref<1x128xf32, #tpu.memory_space<vmem>>, %arg6: memref<16x4xi32, #tpu.memory_space<vmem>>, %arg7: memref<16x128xbf16, #tpu.memory_space<vmem>>, %arg8: memref<8x128xf32, #tpu.memory_space<vmem>>) attributes {dimension_semantics = [#tpu.dimension_semantics<parallel>], iteration_bounds = array<i64: 1>, scalar_prefetch = 0 : i64, scratch_operands = 0 : i64, tpu.core_type = #tpu.core_type<tc>, window_params = [{transform_indices = @transform_0, window_bounds = array<i64: 16, 128>}, {pipeline_mode = #tpu.pipeline_mode<synchronous>, transform_indices = @transform_1, window_bounds = array<i64: 128, 128>}, {pipeline_mode = #tpu.pipeline_mode<synchronous>, transform_indices = @transform_2, window_bounds = array<i64: 1, 128>}, {pipeline_mode = #tpu.pipeline_mode<synchronous>, transform_indices = @transform_3, window_bounds = array<i64: 128, 128>}, {pipeline_mode = #tpu.pipeline_mode<synchronous>, transform_indices = @transform_4, window_bounds = array<i64: 1, 128>}, {transform_indices = @transform_5, window_bounds = array<i64: 16, 4>}, {transform_indices = @transform_6, window_bounds = array<i64: 16, 128>}, {transform_indices = @transform_7, window_bounds = array<i64: 8, 128>}]} {
    %c0 = arith.constant 0 : index
    %c0_0 = arith.constant 0 : index
    %0 = vector.load %arg2[%c0, %c0_0] : memref<128x128xbf16, #tpu.memory_space<vmem>>, vector<128x128xbf16>
    %c0_1 = arith.constant 0 : index
    %c0_2 = arith.constant 0 : index
    %1 = vector.load %arg3[%c0_1, %c0_2] : memref<1x128xf32, #tpu.memory_space<vmem>>, vector<1x128xf32>
    %c0_3 = arith.constant 0 : index
    %c0_4 = arith.constant 0 : index
    %2 = vector.load %arg1[%c0_3, %c0_4] : memref<16x128xf32, #tpu.memory_space<vmem>>, vector<16x128xf32>
    %3 = arith.truncf %2 : vector<16x128xf32> to vector<16x128xbf16>
    %cst = arith.constant dense<0.000000e+00> : vector<16x128xf32>
    %4 = tpu.matmul %3, %0, %cst {dimension_numbers = #tpu.dot_dimension_numbers<[1], [0], [0], [1], [0, 0, 1, 1], [], []>} : vector<16x128xbf16>, vector<128x128xbf16>, vector<16x128xf32> -> vector<16x128xf32>
    %5 = vector.broadcast %1 : vector<1x128xf32> to vector<16x128xf32>
    %6 = arith.addf %4, %5 : vector<16x128xf32>
    %cst_5 = arith.constant 0.000000e+00 : f32
    %7 = vector.broadcast %cst_5 : f32 to vector<16x128xf32>
    %8 = arith.maximumf %6, %7 : vector<16x128xf32>
    %9 = arith.truncf %8 : vector<16x128xf32> to vector<16x128xbf16>
    %cst_6 = arith.constant dense<0.000000e+00> : vector<16x128xf32>
    %10 = tpu.matmul %9, %0, %cst_6 {dimension_numbers = #tpu.dot_dimension_numbers<[1], [0], [0], [1], [0, 0, 1, 1], [], []>} : vector<16x128xbf16>, vector<128x128xbf16>, vector<16x128xf32> -> vector<16x128xf32>
    %11 = vector.broadcast %1 : vector<1x128xf32> to vector<16x128xf32>
    %12 = arith.addf %10, %11 : vector<16x128xf32>
    %cst_7 = arith.constant 0.000000e+00 : f32
    %13 = vector.broadcast %cst_7 : f32 to vector<16x128xf32>
    %14 = arith.maximumf %12, %13 : vector<16x128xf32>
    %15 = arith.truncf %14 : vector<16x128xf32> to vector<16x128xbf16>
    %c0_8 = arith.constant 0 : index
    %c0_9 = arith.constant 0 : index
    %16 = vector.load %arg4[%c0_8, %c0_9] : memref<128x128xbf16, #tpu.memory_space<vmem>>, vector<128x128xbf16>
    %cst_10 = arith.constant dense<0.000000e+00> : vector<16x128xf32>
    %17 = tpu.matmul %15, %16, %cst_10 {dimension_numbers = #tpu.dot_dimension_numbers<[1], [0], [0], [1], [0, 0, 1, 1], [], []>} : vector<16x128xbf16>, vector<128x128xbf16>, vector<16x128xf32> -> vector<16x128xf32>
    %c0_11 = arith.constant 0 : index
    %c0_12 = arith.constant 0 : index
    %18 = vector.load %arg5[%c0_11, %c0_12] : memref<1x128xf32, #tpu.memory_space<vmem>>, vector<1x128xf32>
    %19 = vector.broadcast %18 : vector<1x128xf32> to vector<16x128xf32>
    %20 = arith.addf %17, %19 : vector<16x128xf32>
    %21 = arith.truncf %20 : vector<16x128xf32> to vector<16x128xbf16>
    %c0_13 = arith.constant 0 : index
    %c0_14 = arith.constant 0 : index
    %22 = vector.load %arg7[%c0_13, %c0_14] : memref<16x128xbf16, #tpu.memory_space<vmem>>, vector<16x128xbf16>
    tpu.vector_store %arg7[%c0_13, %c0_14], %21 {strides = array<i32>} : memref<16x128xbf16, #tpu.memory_space<vmem>>, vector<16x128xbf16>,
    %23 = tpu.iota {dimensions = array<i32: 1>} : vector<16x128xi32>
    %c0_15 = arith.constant 0 : index
    %c0_16 = arith.constant 0 : index
    %24 = vector.load %arg6[%c0_15, %c0_16] : memref<16x4xi32, #tpu.memory_space<vmem>>, vector<16x4xi32>
    %cst_17 = arith.constant 0.000000e+00 : f32
    %25 = vector.broadcast %cst_17 : f32 to vector<16x1xf32>
    %c0_i32 = arith.constant 0 : i32
    %26 = vector.broadcast %c0_i32 : i32 to vector<16x128xi32>
    %27 = arith.cmpi sge, %23, %26 : vector<16x128xi32>
    %c3_i32 = arith.constant 3 : i32
    %28 = vector.broadcast %c3_i32 : i32 to vector<16x128xi32>
    %29 = arith.cmpi slt, %23, %28 : vector<16x128xi32>
    %30 = arith.andi %27, %29 : vector<16x128xi1>
    %cst_18 = arith.constant 0xFF800000 : f32
    %31 = vector.broadcast %cst_18 : f32 to vector<16x128xf32>
    %32 = arith.select %30, %20, %31 : vector<16x128xi1>, vector<16x128xf32>
    %cst_19 = arith.constant dense<0xFF800000> : vector<16xf32>
    %33 = vector.multi_reduction <maximumf>, %32, %cst_19 [1] : vector<16x128xf32> to vector<16xf32>
    %34 = vector.shape_cast %33 : vector<16xf32> to vector<16x1xf32>
    %35 = vector.broadcast %34 : vector<16x1xf32> to vector<16x128xf32>
    %36 = arith.subf %32, %35 : vector<16x128xf32>
    %37 = math.exp %36 : vector<16x128xf32>
    %cst_20 = arith.constant dense<0.000000e+00> : vector<16xf32>
    %38 = vector.multi_reduction <add>, %37, %cst_20 [1] : vector<16x128xf32> to vector<16xf32>
    %39 = vector.shape_cast %38 : vector<16xf32> to vector<16x1xf32>
    %40 = math.log %39 : vector<16x1xf32>
    %41 = arith.addf %34, %40 : vector<16x1xf32>
    %42 = vector.extract_strided_slice %24 {offsets = [0, 0], sizes = [16, 1], strides = [1, 1]} : vector<16x4xi32> to vector<16x1xi32>
    %c0_i32_21 = arith.constant 0 : i32
    %43 = vector.broadcast %c0_i32_21 : i32 to vector<16x1xi32>
    %44 = arith.addi %43, %42 : vector<16x1xi32>
    %45 = vector.broadcast %44 : vector<16x1xi32> to vector<16x128xi32>
    %46 = arith.cmpi eq, %23, %45 : vector<16x128xi32>
    %cst_22 = arith.constant 0.000000e+00 : f32
    %47 = vector.broadcast %cst_22 : f32 to vector<16x128xf32>
    %48 = arith.select %46, %20, %47 : vector<16x128xi1>, vector<16x128xf32>
    %cst_23 = arith.constant dense<0.000000e+00> : vector<16xf32>
    %49 = vector.multi_reduction <add>, %48, %cst_23 [1] : vector<16x128xf32> to vector<16xf32>
    %50 = vector.shape_cast %49 : vector<16xf32> to vector<16x1xf32>
    %51 = arith.subf %41, %50 : vector<16x1xf32>
    %52 = arith.addf %25, %51 : vector<16x1xf32>
    %c3_i32_24 = arith.constant 3 : i32
    %53 = vector.broadcast %c3_i32_24 : i32 to vector<16x128xi32>
    %54 = arith.cmpi sge, %23, %53 : vector<16x128xi32>
    %c6_i32 = arith.constant 6 : i32
    %55 = vector.broadcast %c6_i32 : i32 to vector<16x128xi32>
    %56 = arith.cmpi slt, %23, %55 : vector<16x128xi32>
    %57 = arith.andi %54, %56 : vector<16x128xi1>
    %cst_25 = arith.constant 0xFF800000 : f32
    %58 = vector.broadcast %cst_25 : f32 to vector<16x128xf32>
    %59 = arith.select %57, %20, %58 : vector<16x128xi1>, vector<16x128xf32>
    %cst_26 = arith.constant dense<0xFF800000> : vector<16xf32>
    %60 = vector.multi_reduction <maximumf>, %59, %cst_26 [1] : vector<16x128xf32> to vector<16xf32>
    %61 = vector.shape_cast %60 : vector<16xf32> to vector<16x1xf32>
    %62 = vector.broadcast %61 : vector<16x1xf32> to vector<16x128xf32>
    %63 = arith.subf %59, %62 : vector<16x128xf32>
    %64 = math.exp %63 : vector<16x128xf32>
    %cst_27 = arith.constant dense<0.000000e+00> : vector<16xf32>
    %65 = vector.multi_reduction <add>, %64, %cst_27 [1] : vector<16x128xf32> to vector<16xf32>
    %66 = vector.shape_cast %65 : vector<16xf32> to vector<16x1xf32>
    %67 = math.log %66 : vector<16x1xf32>
    %68 = arith.addf %61, %67 : vector<16x1xf32>
    %69 = vector.extract_strided_slice %24 {offsets = [0, 1], sizes = [16, 1], strides = [1, 1]} : vector<16x4xi32> to vector<16x1xi32>
    %c3_i32_28 = arith.constant 3 : i32
    %70 = vector.broadcast %c3_i32_28 : i32 to vector<16x1xi32>
    %71 = arith.addi %70, %69 : vector<16x1xi32>
    %72 = vector.broadcast %71 : vector<16x1xi32> to vector<16x128xi32>
    %73 = arith.cmpi eq, %23, %72 : vector<16x128xi32>
    %cst_29 = arith.constant 0.000000e+00 : f32
    %74 = vector.broadcast %cst_29 : f32 to vector<16x128xf32>
    %75 = arith.select %73, %20, %74 : vector<16x128xi1>, vector<16x128xf32>
    %cst_30 = arith.constant dense<0.000000e+00> : vector<16xf32>
    %76 = vector.multi_reduction <add>, %75, %cst_30 [1] : vector<16x128xf32> to vector<16xf32>
    %77 = vector.shape_cast %76 : vector<16xf32> to vector<16x1xf32>
    %78 = arith.subf %68, %77 : vector<16x1xf32>
    %79 = arith.addf %52, %78 : vector<16x1xf32>
    %c6_i32_31 = arith.constant 6 : i32
    %80 = vector.broadcast %c6_i32_31 : i32 to vector<16x128xi32>
    %81 = arith.cmpi sge, %23, %80 : vector<16x128xi32>
    %c9_i32 = arith.constant 9 : i32
    %82 = vector.broadcast %c9_i32 : i32 to vector<16x128xi32>
    %83 = arith.cmpi slt, %23, %82 : vector<16x128xi32>
    %84 = arith.andi %81, %83 : vector<16x128xi1>
    %cst_32 = arith.constant 0xFF800000 : f32
    %85 = vector.broadcast %cst_32 : f32 to vector<16x128xf32>
    %86 = arith.select %84, %20, %85 : vector<16x128xi1>, vector<16x128xf32>
    %cst_33 = arith.constant dense<0xFF800000> : vector<16xf32>
    %87 = vector.multi_reduction <maximumf>, %86, %cst_33 [1] : vector<16x128xf32> to vector<16xf32>
    %88 = vector.shape_cast %87 : vector<16xf32> to vector<16x1xf32>
    %89 = vector.broadcast %88 : vector<16x1xf32> to vector<16x128xf32>
    %90 = arith.subf %86, %89 : vector<16x128xf32>
    %91 = math.exp %90 : vector<16x128xf32>
    %cst_34 = arith.constant dense<0.000000e+00> : vector<16xf32>
    %92 = vector.multi_reduction <add>, %91, %cst_34 [1] : vector<16x128xf32> to vector<16xf32>
    %93 = vector.shape_cast %92 : vector<16xf32> to vector<16x1xf32>
    %94 = math.log %93 : vector<16x1xf32>
    %95 = arith.addf %88, %94 : vector<16x1xf32>
    %96 = vector.extract_strided_slice %24 {offsets = [0, 2], sizes = [16, 1], strides = [1, 1]} : vector<16x4xi32> to vector<16x1xi32>
    %c6_i32_35 = arith.constant 6 : i32
    %97 = vector.broadcast %c6_i32_35 : i32 to vector<16x1xi32>
    %98 = arith.addi %97, %96 : vector<16x1xi32>
    %99 = vector.broadcast %98 : vector<16x1xi32> to vector<16x128xi32>
    %100 = arith.cmpi eq, %23, %99 : vector<16x128xi32>
    %cst_36 = arith.constant 0.000000e+00 : f32
    %101 = vector.broadcast %cst_36 : f32 to vector<16x128xf32>
    %102 = arith.select %100, %20, %101 : vector<16x128xi1>, vector<16x128xf32>
    %cst_37 = arith.constant dense<0.000000e+00> : vector<16xf32>
    %103 = vector.multi_reduction <add>, %102, %cst_37 [1] : vector<16x128xf32> to vector<16xf32>
    %104 = vector.shape_cast %103 : vector<16xf32> to vector<16x1xf32>
    %105 = arith.subf %95, %104 : vector<16x1xf32>
    %106 = arith.addf %79, %105 : vector<16x1xf32>
    %c9_i32_38 = arith.constant 9 : i32
    %107 = vector.broadcast %c9_i32_38 : i32 to vector<16x128xi32>
    %108 = arith.cmpi sge, %23, %107 : vector<16x128xi32>
    %c12_i32 = arith.constant 12 : i32
    %109 = vector.broadcast %c12_i32 : i32 to vector<16x128xi32>
    %110 = arith.cmpi slt, %23, %109 : vector<16x128xi32>
    %111 = arith.andi %108, %110 : vector<16x128xi1>
    %cst_39 = arith.constant 0xFF800000 : f32
    %112 = vector.broadcast %cst_39 : f32 to vector<16x128xf32>
    %113 = arith.select %111, %20, %112 : vector<16x128xi1>, vector<16x128xf32>
    %cst_40 = arith.constant dense<0xFF800000> : vector<16xf32>
    %114 = vector.multi_reduction <maximumf>, %113, %cst_40 [1] : vector<16x128xf32> to vector<16xf32>
    %115 = vector.shape_cast %114 : vector<16xf32> to vector<16x1xf32>
    %116 = vector.broadcast %115 : vector<16x1xf32> to vector<16x128xf32>
    %117 = arith.subf %113, %116 : vector<16x128xf32>
    %118 = math.exp %117 : vector<16x128xf32>
    %cst_41 = arith.constant dense<0.000000e+00> : vector<16xf32>
    %119 = vector.multi_reduction <add>, %118, %cst_41 [1] : vector<16x128xf32> to vector<16xf32>
    %120 = vector.shape_cast %119 : vector<16xf32> to vector<16x1xf32>
    %121 = math.log %120 : vector<16x1xf32>
    %122 = arith.addf %115, %121 : vector<16x1xf32>
    %123 = vector.extract_strided_slice %24 {offsets = [0, 3], sizes = [16, 1], strides = [1, 1]} : vector<16x4xi32> to vector<16x1xi32>
    %c9_i32_42 = arith.constant 9 : i32
    %124 = vector.broadcast %c9_i32_42 : i32 to vector<16x1xi32>
    %125 = arith.addi %124, %123 : vector<16x1xi32>
    %126 = vector.broadcast %125 : vector<16x1xi32> to vector<16x128xi32>
    %127 = arith.cmpi eq, %23, %126 : vector<16x128xi32>
    %cst_43 = arith.constant 0.000000e+00 : f32
    %128 = vector.broadcast %cst_43 : f32 to vector<16x128xf32>
    %129 = arith.select %127, %20, %128 : vector<16x128xi1>, vector<16x128xf32>
    %cst_44 = arith.constant dense<0.000000e+00> : vector<16xf32>
    %130 = vector.multi_reduction <add>, %129, %cst_44 [1] : vector<16x128xf32> to vector<16xf32>
    %131 = vector.shape_cast %130 : vector<16xf32> to vector<16x1xf32>
    %132 = arith.subf %122, %131 : vector<16x1xf32>
    %133 = arith.addf %106, %132 : vector<16x1xf32>
    %c16_i32 = arith.constant 16 : i32
    %134 = arith.muli %arg0, %c16_i32 : i32
    %135 = tpu.iota {dimensions = array<i32: 0>} : vector<16x1xi32>
    %136 = vector.broadcast %134 : i32 to vector<16x1xi32>
    %137 = arith.addi %136, %135 : vector<16x1xi32>
    %c2_i32 = arith.constant 2 : i32
    %138 = vector.broadcast %c2_i32 : i32 to vector<16x1xi32>
    %139 = arith.cmpi slt, %137, %138 : vector<16x1xi32>
    %cst_45 = arith.constant 0.000000e+00 : f32
    %140 = vector.broadcast %cst_45 : f32 to vector<16x1xf32>
    %141 = arith.select %139, %133, %140 : vector<16x1xi1>, vector<16x1xf32>
    %cst_46 = arith.constant dense<0.000000e+00> : vector<1xf32>
    %142 = vector.multi_reduction <add>, %141, %cst_46 [0] : vector<16x1xf32> to vector<1xf32>
    %143 = vector.shape_cast %142 : vector<1xf32> to vector<1x1xf32>
    %144 = vector.shape_cast %143 : vector<1x1xf32> to vector<1x1xf32>
    %145 = vector.broadcast %144 : vector<1x1xf32> to vector<8x128xf32>
    %c0_47 = arith.constant 0 : index
    %c0_48 = arith.constant 0 : index
    %146 = vector.load %arg8[%c0_47, %c0_48] : memref<8x128xf32, #tpu.memory_space<vmem>>, vector<8x128xf32>
    tpu.vector_store %arg8[%c0_47, %c0_48], %145 {strides = array<i32>} : memref<8x128xf32, #tpu.memory_space<vmem>>, vector<8x128xf32>,
    return
  }
  func.func @transform_0(%arg0: i32) -> (i32, i32) {
    %c0_i32 = arith.constant 0 : i32
    %c0_i32_0 = arith.constant 0 : i32
    return %arg0, %c0_i32 : i32, i32
  }
  func.func @transform_1(%arg0: i32) -> (i32, i32) {
    %c0_i32 = arith.constant 0 : i32
    %c0_i32_0 = arith.constant 0 : i32
    %c0_i32_1 = arith.constant 0 : i32
    return %c0_i32, %c0_i32_0 : i32, i32
  }
  func.func @transform_2(%arg0: i32) -> (i32, i32) {
    %c0_i32 = arith.constant 0 : i32
    %c0_i32_0 = arith.constant 0 : i32
    %c0_i32_1 = arith.constant 0 : i32
    return %c0_i32, %c0_i32_0 : i32, i32
  }
  func.func @transform_3(%arg0: i32) -> (i32, i32) {
    %c0_i32 = arith.constant 0 : i32
    %c0_i32_0 = arith.constant 0 : i32
    %c0_i32_1 = arith.constant 0 : i32
    return %c0_i32, %c0_i32_0 : i32, i32
  }
  func.func @transform_4(%arg0: i32) -> (i32, i32) {
    %c0_i32 = arith.constant 0 : i32
    %c0_i32_0 = arith.constant 0 : i32
    %c0_i32_1 = arith.constant 0 : i32
    return %c0_i32, %c0_i32_0 : i32, i32
  }
  func.func @transform_5(%arg0: i32) -> (i32, i32) {
    %c0_i32 = arith.constant 0 : i32
    %c0_i32_0 = arith.constant 0 : i32
    return %arg0, %c0_i32 : i32, i32
  }
  func.func @transform_6(%arg0: i32) -> (i32, i32) {
    %c0_i32 = arith.constant 0 : i32
    %c0_i32_0 = arith.constant 0 : i32
    return %arg0, %c0_i32 : i32, i32
  }
  func.func @transform_7(%arg0: i32) -> (i32, i32) {
    %c0_i32 = arith.constant 0 : i32
    %c0_i32_0 = arith.constant 0 : i32
    return %arg0, %c0_i32 : i32, i32
  }
}

</mosaic_0001>

<bundles_post_ra>
// kernel: tpu_custom_call.1
= control target key start
LH: loop header
LB: loop body
LE: loop exit
PB: predicated region body
PF: predicated region fallthrough
CT: control target
= control target key end

     0   :  { %13 = vsyncpa [#allocation3], 0  ;;  %s984_s0 = inlined_call_operand.vmem [shape: f32[16,128], index: 0, kind: input, shape index: {}]   ;;  %s985_s1 = inlined_call_operand.hbm [shape: bf16[128,128], index: 1, kind: input, shape index: {}]   ;;  %s986_s2 = inlined_call_operand.vmem [shape: f32[1,128], index: 2, kind: input, shape index: {}]   ;;  %s987_s3 = inlined_call_operand.hbm [shape: bf16[128,128], index: 3, kind: input, shape index: {}]   ;;  %s988_s4 = inlined_call_operand.vmem [shape: f32[1,128], index: 4, kind: input, shape index: {}]   ;;  %s989_s5 = inlined_call_operand.vmem [shape: s32[16,4], index: 5, kind: input, shape index: {}]   ;;  %s990_s6 = inlined_call_operand.hbm [shape: bf16[16,128], index: 6, kind: output, shape index: {0}]   ;;  %s991_s7 = inlined_call_operand.hbm [shape: f32[8,128], index: 7, kind: output, shape index: {1}]  }
   0x1   :  { %14 = vsyncpa [#allocation6], 0 }
   0x2   :  { %15 = vsyncpa [#allocation4], 0 }
   0x3   :  { %16 = vsyncpa [#allocation9], 0  ;;  %s824_s24 = smov [#allocation2]  }
   0x4   :  { %s24_s25 = sshll.u32 %s824_s24, 4  ;;  %s25_s25 = int_to_ptr.vmem [resolvable:$true] %s24_s25 }
   0x5   :  { %s744_s26 = scalar_lea.vmem %s25_s25, 1024  ;;  %p749_p1 = scmp.lt.s32.totalorder %s25_s25, %s25_s25 }
   0x6   :  { %p745_p0 = scmp.ne.s32.totalorder %s25_s25, %s744_s26  ;;  %p750_p2 = scmp.lt.s32.totalorder %s744_s26, %s744_s26 }
   0x8   :  { %p751_p3 = por %p750_p2, %p749_p1 }
   0xa   :  { %p752_p4 = pnand %p751_p3, %p745_p0 }
   0xc   :  { %755 = shalt.err (!%p752_p4)
}
   0xd   :  { %s825_s27 = smov 64   ;;  %s826_s28 = smov 4  }
   0xe   :  { %30 = dma.hbm_to_vmem [thread:$0]  %s985_s1, 1024, %s25_s25, [#allocation3], %s825_s27, %s825_s27, %s826_s28  }
   0xf   :  { %s827_s8 = smov [#allocation5]  }
  0x10   :  { %s38_s9 = sshll.u32 %s827_s8, 4  ;;  %s39_s9 = int_to_ptr.vmem [resolvable:$true] %s38_s9 }
  0x11   :  { %s764_s10 = scalar_lea.vmem %s39_s9, 1024  ;;  %p769_p6 = scmp.lt.s32.totalorder %s39_s9, %s39_s9 }
  0x12   :  { %p765_p5 = scmp.ne.s32.totalorder %s39_s9, %s764_s10  ;;  %p770_p7 = scmp.lt.s32.totalorder %s764_s10, %s764_s10 }
  0x14   :  { %p771_p8 = por %p770_p7, %p769_p6 }
  0x16   :  { %p772_p9 = pnand %p771_p8, %p765_p5 }
  0x18   :  { %775 = shalt.err (!%p772_p9)
}
  0x19   :  { %44 = dma.hbm_to_vmem [thread:$0]  %s987_s3, 1024, %s39_s9, [#allocation6], %s825_s27, %s825_s27, %s826_s28  }
  0x1a   :  { %816 = dma.done.wait [#allocation3], 1024  }
  0x1b   :  { %817 = vsyncadd [#allocation3], 4294966272 }
  0x1c   :  { %818 = dma.done.wait [#allocation6], 1024  }
  0x1d   :  { %819 = vsyncadd [#allocation6], 4294966272  ;;  %v828_v0 = vmov 0.0   ;;  %vm829_vm0 = vmmov 0   ;;  %v704_v1 = vld [vmem:[#allocation2 + $0x38] sm:$0xff]   ;;  %v705_v2 = vld [vmem:[#allocation2 + $0x30] sm:$0xff]   ;;  %v340_v41 = vlaneseq }
  0x1e   :  { %627 = vmatprep.subr.bf16.mxu0 %v828_v0  ;;  %643 = vmatprep.mubr.msk.bf16.mxu0 %vm829_vm0, %v828_v0  ;;  %v706_v3 = vld [vmem:[#allocation2 + $0x28] sm:$0xff]   ;;  %v707_v4 = vld [vmem:[#allocation2 + $0x20] sm:$0xff]   ;;  %v708_v5 = vld [vmem:[#allocation2 + $0x18] sm:$0xff]   ;;  %v830_v39 = vmov 0   ;;  %v831_v40 = vmov 1   ;;  %v832_v58 = vmov 2  }
  0x1f   :  { %647 = vmatprep.subr.bf16.mxu1 %v828_v0  ;;  %663 = vmatprep.mubr.msk.bf16.mxu1 %vm829_vm0, %v828_v0  ;;  %v709_v6 = vld [vmem:[#allocation2 + $0x10] sm:$0xff]   ;;  %v710_v7 = vld [vmem:[#allocation2 + $0x8] sm:$0xff]   ;;  %v711_v8 = vld [vmem:[#allocation2] sm:$0xff]   ;;  %v928_v42 = vand.u32 127, %v340_v41  ;;  %v833_v60 = vmov 3  }
  0x20   :  { %628 = vmatpush3.bf16.msra.mxu0 %v704_v1  ;;  %648 = vmatpush3.bf16.msra.mxu1 %v704_v1  ;;  %v73_v9 = vld [vmem:[%s984_s0] sm:$0xff]  ;;  %v74_v10 = vld [vmem:[%s984_s0 + $0x8] sm:$0xff]  ;;  %v712_v12 = vld [vmem:[#allocation5 + $0x38] sm:$0xff]  }
  0x21   :  { %629 = vmatprep.subr.bf16.mxu0 %v828_v0  ;;  %649 = vmatprep.subr.bf16.mxu1 %v828_v0  ;;  %v75_v11 = vpack.c.bf16 %v74_v10, %v73_v9  ;;  %v713_v13 = vld [vmem:[#allocation5 + $0x30] sm:$0xff]   ;;  %v714_v14 = vld [vmem:[#allocation5 + $0x28] sm:$0xff]   ;;  %v715_v15 = vld [vmem:[#allocation5 + $0x20] sm:$0xff]   ;;  %vm432_vm1 = vcmp.ge.s32.totalorder %v928_v42, 6  ;;  %vm433_vm2 = vcmp.lt.s32.totalorder %v928_v42, 9  ;;  %vm345_vm4 = vcmp.lt.s32.totalorder %v928_v42, 3 }
  0x22   :  { %v716_v16 = vld [vmem:[#allocation5 + $0x18] sm:$0xff]   ;;  %v573_v17 = vld [vmem:[%s986_s2] ss:$0 sm:$0xff]  ;;  %v717_v27 = vld [vmem:[#allocation5 + $0x10] sm:$0xff]   ;;  %699 = vset.pattern.permute.xlu1 %v830_v39  ;;  %700 = vset.pattern.permute.xlu0 %v831_v40  ;;  %vm477_vm5 = vcmp.ge.s32.totalorder %v928_v42, 9  ;;  %vm478_vm6 = vcmp.lt.s32.totalorder %v928_v42, 12 }
  0x23   :  { %v718_v28 = vld [vmem:[#allocation5 + $0x8] sm:$0xff]   ;;  %v719_v29 = vld [vmem:[#allocation5] sm:$0xff]   ;;  %vm434_vm3 = vmand %vm432_vm1, %vm433_vm2  ;;  %vm387_vm7 = vcmp.ge.s32.totalorder %v928_v42, 3  ;;  %vm388_vm8 = vcmp.lt.s32.totalorder %v928_v42, 6 }
  0x24   :  { %630 = vmatpush3.bf16.msra.mxu0 %v705_v2  ;;  %650 = vmatpush3.bf16.msra.mxu1 %v705_v2  ;;  %v582_v43 = vld [vmem:[%s988_s4] ss:$0 sm:$0xff]  ;;  %vm479_vm9 = vmand %vm477_vm5, %vm478_vm6 }
  0x25   :  { %631 = vmatprep.subr.bf16.mxu0 %v828_v0  ;;  %651 = vmatprep.subr.bf16.mxu1 %v828_v0  ;;  %vm389_vm10 = vmand %vm387_vm7, %vm388_vm8  ;;  %v342_v55 = vld [vmem:[%s989_s5] sm:$0xff]  ;;  %s834_s5 = smov [#allocation7]  }
  0x26   :  { %v457_v56 = vadd.s32 6, %v342_v55  ;;  %v412_v57 = vadd.s32 3, %v342_v55  ;;  %v502_v59 = vadd.s32 9, %v342_v55  ;;  %s546_s18 = sshll.u32 %s834_s5, 4  ;;  %s547_s18 = int_to_ptr.vmem [resolvable:$true] %s546_s18 }
  0x27   :  { %s776_s19 = scalar_lea.vmem %s547_s18, 128  ;;  %p781_p11 = scmp.lt.s32.totalorder %s547_s18, %s547_s18 }
  0x28   :  { %632 = vmatpush3.bf16.msra.mxu0 %v706_v3  ;;  %652 = vmatpush3.bf16.msra.mxu1 %v706_v3  ;;  %p777_p10 = scmp.ne.s32.totalorder %s547_s18, %s776_s19  ;;  %p782_p12 = scmp.lt.s32.totalorder %s776_s19, %s776_s19 }
  0x29   :  { %633 = vmatprep.subr.bf16.mxu0 %v828_v0  ;;  %653 = vmatprep.subr.bf16.mxu1 %v828_v0 }
  0x2a   :  { %p783_p13 = por %p782_p12, %p781_p11 }
  0x2c   :  { %634 = vmatpush3.bf16.msra.mxu0 %v707_v4  ;;  %654 = vmatpush3.bf16.msra.mxu1 %v707_v4  ;;  %p784_p0 = pnand %p783_p13, %p777_p10 }
  0x2d   :  { %635 = vmatprep.subr.bf16.mxu0 %v828_v0  ;;  %655 = vmatprep.subr.bf16.mxu1 %v828_v0 }
  0x30   :  { %636 = vmatpush3.bf16.msra.mxu0 %v708_v5  ;;  %656 = vmatpush3.bf16.msra.mxu1 %v708_v5 }
  0x31   :  { %637 = vmatprep.subr.bf16.mxu0 %v828_v0  ;;  %657 = vmatprep.subr.bf16.mxu1 %v828_v0 }
  0x34   :  { %638 = vmatpush3.bf16.msra.mxu0 %v709_v6  ;;  %658 = vmatpush3.bf16.msra.mxu1 %v709_v6 }
  0x35   :  { %639 = vmatprep.subr.bf16.mxu0 %v828_v0  ;;  %659 = vmatprep.subr.bf16.mxu1 %v828_v0 }
  0x38   :  { %640 = vmatpush3.bf16.msra.mxu0 %v710_v7  ;;  %660 = vmatpush3.bf16.msra.mxu1 %v710_v7 }
  0x39   :  { %641 = vmatprep.subr.bf16.mxu0 %v828_v0  ;;  %661 = vmatprep.subr.bf16.mxu1 %v828_v0 }
  0x3c   :  { %642 = vmatpush3.bf16.msra.mxu0 %v711_v8  ;;  %662 = vmatpush3.bf16.msra.mxu1 %v711_v8 }
  0x3d   :  { %667 = vmatprep.subr.bf16.mxu0 %v828_v0 }
  0x3f   :  { %644 = vmatmul.mubr.bf16.vlgmr.msra.gmra.mxu0 %v75_v11 }
  0x40   :  { %683 = vmatprep.mubr.msk.bf16.mxu0 %vm829_vm0, %v828_v0  ;;  %668 = vmatpush3.bf16.msra.mxu0 %v712_v12 }
  0x41   :  { %669 = vmatprep.subr.bf16.mxu0 %v828_v0 }
  0x44   :  { %670 = vmatpush3.bf16.msra.mxu0 %v713_v13 }
  0x45   :  { %671 = vmatprep.subr.bf16.mxu0 %v828_v0 }
  0x48   :  { %672 = vmatpush3.bf16.msra.mxu0 %v714_v14 }
  0x49   :  { %673 = vmatprep.subr.bf16.mxu0 %v828_v0 }
  0x4c   :  { %674 = vmatpush3.bf16.msra.mxu0 %v715_v15 }
  0x4d   :  { %675 = vmatprep.subr.bf16.mxu0 %v828_v0 }
  0x50   :  { %676 = vmatpush3.bf16.msra.mxu0 %v716_v16 }
  0x51   :  { %677 = vmatprep.subr.bf16.mxu0 %v828_v0 }
  0x54   :  { %678 = vmatpush3.bf16.msra.mxu0 %v717_v27 }
  0x55   :  { %679 = vmatprep.subr.bf16.mxu0 %v828_v0 }
  0x58   :  { %680 = vmatpush3.bf16.msra.mxu0 %v718_v28 }
  0x59   :  { %681 = vmatprep.subr.bf16.mxu0 %v828_v0 }
  0x5c   :  { %682 = vmatpush3.bf16.msra.mxu0 %v719_v29 }
  0xff   :  { %v164_v18 = vpop.f32.mrf.mxu0 }
 0x100   :  { %v165_v20 = vadd.f32 %v573_v17, %v164_v18 }
 0x101   :  { %v645_v19 = vpop.f32.mrf.mxu0 }
 0x102   :  { %v171_v24 = vmax.f32 %v165_v20, 0.0 }
 0x103   :  { %v167_v21 = vpop.f32.mrf.mxu0 }
 0x104   :  { %v168_v22 = vadd.f32 %v573_v17, %v167_v21 }
 0x105   :  { %v646_v23 = vpop.f32.mrf.mxu0 }
 0x106   :  { %v172_v25 = vmax.f32 %v168_v22, 0.0 }
 0x108   :  { %v173_v26 = vpack.c.bf16 %v172_v25, %v171_v24 }
 0x10a   :  { %664 = vmatmul.mubr.bf16.vlgmr.msra.gmra.mxu1 %v173_v26 }
 0x1ca   :  { %v208_v30 = vpop.f32.mrf.mxu1 }
 0x1cb   :  { %v209_v32 = vadd.f32 %v573_v17, %v208_v30 }
 0x1cc   :  { %v665_v31 = vpop.f32.mrf.mxu1 }
 0x1cd   :  { %v215_v36 = vmax.f32 %v209_v32, 0.0 }
 0x1ce   :  { %v211_v33 = vpop.f32.mrf.mxu1 }
 0x1cf   :  { %v212_v34 = vadd.f32 %v573_v17, %v211_v33 }
 0x1d0   :  { %v666_v35 = vpop.f32.mrf.mxu1 }
 0x1d1   :  { %v216_v37 = vmax.f32 %v212_v34, 0.0 }
 0x1d3   :  { %v217_v38 = vpack.c.bf16 %v216_v37, %v215_v36 }
 0x1d5   :  { %684 = vmatmul.mubr.bf16.vlgmr.msra.gmra.mxu0 %v217_v38 }
 0x295   :  { %v323_v44 = vpop.f32.mrf.mxu0 }
 0x296   :  { %v938_v45 = vadd.f32 %v582_v43, %v323_v44 }
 0x297   :  { %v685_v46 = vpop.f32.mrf.mxu0 }
 0x298   :  { %v435_v47 = vsel %vm434_vm3, %v938_v45, -inf  ;;  %v347_v48 = vsel %vm345_vm4, %v938_v45, -inf  ;;  %v480_v53 = vsel %vm479_vm9, %v938_v45, -inf  ;;  %v390_v54 = vsel %vm389_vm10, %v938_v45, -inf }
 0x299   :  { %437 = vmax.xlane.f32.xlu1 %v435_v47  ;;  %349 = vmax.xlane.f32.xlu0 %v347_v48  ;;  %v326_v49 = vpop.f32.mrf.mxu0 }
 0x29a   :  { %v327_v50 = vadd.f32 %v582_v43, %v326_v49 }
 0x29b   :  { %v686_v51 = vpop.f32.mrf.mxu0 }
 0x29c   :  { %v598_v52 = vpack.c.bf16 %v327_v50, %v938_v45 }
 0x29d   :  { %482 = vmax.xlane.f32.xlu1 %v480_v53  ;;  %392 = vmax.xlane.f32.xlu0 %v390_v54 }
 0x29e   :  { %599 = vst [vmem:[#allocation7] sm:$0xff] %v598_v52  }
 0x2ae   :  { %370 = vperm.xlu1 %699, %v342_v55  }
 0x2b2   :  { %701 = vset.pattern.permute.xlu1 %v832_v58 }
 0x2b3   :  { %460 = vperm.xlu1 %701, %v457_v56   ;;  %415 = vperm.xlu0 %700, %v412_v57  }
 0x2b7   :  { %702 = vset.pattern.permute.xlu1 %v833_v60  ;;  %703 = vset.pattern.permute.xlu0 %v833_v60 }
 0x2b8   :  { %505 = vperm.xlu1 %702, %v502_v59  }
 0x322   :  { %v950_v61 = vpop.xlane.xlu1 %437  ;;  %v952_v62 = vpop.xlane.xlu0 %349 }
 0x323   :  { %v441_v63 = vsub.f32 %v435_v47, %v950_v61  ;;  %v353_v0 = vsub.f32 %v347_v48, %v952_v62 }
 0x325   :  { %v443_v1 = vmul.f32 1.442695, %v441_v63  ;;  %v355_v2 = vmul.f32 1.442695, %v353_v0 }
 0x326   :  { %v956_v3 = vpop.xlane.xlu1 %482  ;;  %v958_v4 = vpop.xlane.xlu0 %392 }
 0x327   :  { %720 = vpow2.f32 %v443_v1  ;;  %v486_v5 = vsub.f32 %v480_v53, %v956_v3  ;;  %v396_v6 = vsub.f32 %v390_v54, %v958_v4 }
 0x328   :  { %722 = vpow2.f32 %v355_v2 }
 0x329   :  { %v488_v7 = vmul.f32 1.442695, %v486_v5  ;;  %v398_v8 = vmul.f32 1.442695, %v396_v6 }
 0x32a   :  { %v371_v9 = vpop.permute.xlu1 %370 }
 0x32b   :  { %724 = vpow2.f32 %v488_v7  ;;  %vm375_vm11 = vcmp.eq.s32.totalorder %v928_v42, %v371_v9 }
 0x32c   :  { %726 = vpow2.f32 %v398_v8  ;;  %v377_v10 = vsel %vm375_vm11, %v938_v45, 0.0 }
 0x32d   :  { %379 = vadd.xlane.f32.xlu1 %v377_v10 }
 0x32e   :  { %v416_v13 = vpop.permute.xlu0 %415  ;;  %v461_v15 = vpop.permute.xlu1 %460 }
 0x32f   :  { %vm420_vm12 = vcmp.eq.s32.totalorder %v928_v42, %v416_v13  ;;  %vm465_vm13 = vcmp.eq.s32.totalorder %v928_v42, %v461_v15 }
 0x330   :  { %v422_v17 = vsel %vm420_vm12, %v938_v45, 0.0  ;;  %v467_v19 = vsel %vm465_vm13, %v938_v45, 0.0 }
 0x333   :  { %v506_v18 = vpop.permute.xlu1 %505 }
 0x334   :  { %v721_v11 = vpop.eup %720  ;;  %vm510_vm14 = vcmp.eq.s32.totalorder %v928_v42, %v506_v18 }
 0x335   :  { %v723_v12 = vpop.eup %722  ;;  %447 = vadd.xlane.f32.xlu1 %v721_v11  ;;  %v512_v20 = vsel %vm510_vm14, %v938_v45, 0.0 }
 0x336   :  { %359 = vadd.xlane.f32.xlu0 %v723_v12 }
 0x338   :  { %v725_v14 = vpop.eup %724 }
 0x339   :  { %v727_v16 = vpop.eup %726  ;;  %492 = vadd.xlane.f32.xlu1 %v725_v14 }
 0x33a   :  { %402 = vadd.xlane.f32.xlu0 %v727_v16 }
 0x33d   :  { %424 = vadd.xlane.f32.xlu1 %v422_v17 }
 0x341   :  { %469 = vadd.xlane.f32.xlu1 %v467_v19 }
 0x345   :  { %514 = vadd.xlane.f32.xlu1 %v512_v20 }
 0x346   :  { %787 = shalt.err (!%p784_p0)
}
 0x347   :  { %552 = dma.vmem_to_hbm [thread:$0]  %s547_s18, 128, %s990_s6, [#allocation4], %s825_s27, %s825_s27, %s826_s28   ;;  %v524_v43 = vshrl.u32 %v340_v41, 7 }
 0x348   :  { %s835_s6 = smov [#allocation8]  }
 0x349   :  { %vm529_vm15 = vcmp.lt.s32.totalorder %v524_v43, 2  ;;  %s559_s22 = sshll.u32 %s835_s6, 4  ;;  %s560_s22 = int_to_ptr.vmem [resolvable:$true] %s559_s22 }
 0x34a   :  { %s796_s23 = scalar_lea.vmem %s560_s22, 128  ;;  %p801_p2 = scmp.lt.s32.totalorder %s560_s22, %s560_s22 }
 0x34b   :  { %p797_p1 = scmp.ne.s32.totalorder %s560_s22, %s796_s23  ;;  %p802_p3 = scmp.lt.s32.totalorder %s796_s23, %s796_s23 }
 0x34d   :  { %p803_p4 = por %p802_p3, %p801_p2 }
 0x34f   :  { %p804_p5 = pnand %p803_p4, %p797_p1 }
 0x3b6   :  { %v380_v21 = vpop.xlane.xlu1 %379 }
 0x3be   :  { %v448_v22 = vpop.xlane.xlu1 %447 }
 0x3bf   :  { %728 = vlog2.f32 %v448_v22  ;;  %v360_v23 = vpop.xlane.xlu0 %359 }
 0x3c0   :  { %730 = vlog2.f32 %v360_v23 }
 0x3c2   :  { %v493_v24 = vpop.xlane.xlu1 %492 }
 0x3c3   :  { %732 = vlog2.f32 %v493_v24  ;;  %v403_v25 = vpop.xlane.xlu0 %402 }
 0x3c4   :  { %734 = vlog2.f32 %v403_v25 }
 0x3c6   :  { %v425_v28 = vpop.xlane.xlu1 %424 }
 0x3ca   :  { %v470_v36 = vpop.xlane.xlu1 %469 }
 0x3cc   :  { %v729_v26 = vpop.eup %728 }
 0x3cd   :  { %v731_v27 = vpop.eup %730  ;;  %v452_v31 = vmul.f32 0.6931472, %v729_v26 }
 0x3ce   :  { %v364_v29 = vmul.f32 0.6931472, %v731_v27  ;;  %v515_v46 = vpop.xlane.xlu1 %514 }
 0x3cf   :  { %v455_v38 = vadd.f32 %v452_v31, %v950_v61 }
 0x3d0   :  { %v733_v30 = vpop.eup %732  ;;  %v367_v33 = vadd.f32 %v364_v29, %v952_v62 }
 0x3d1   :  { %v735_v32 = vpop.eup %734  ;;  %v497_v34 = vmul.f32 0.6931472, %v733_v30  ;;  %v473_v45 = vsub.f32 %v455_v38, %v470_v36 }
 0x3d2   :  { %v407_v35 = vmul.f32 0.6931472, %v735_v32  ;;  %v383_v39 = vsub.f32 %v367_v33, %v380_v21 }
 0x3d3   :  { %v500_v42 = vadd.f32 %v497_v34, %v956_v3 }
 0x3d4   :  { %v410_v37 = vadd.f32 %v407_v35, %v958_v4 }
 0x3d5   :  { %v518_v48 = vsub.f32 %v500_v42, %v515_v46 }
 0x3d6   :  { %v428_v40 = vsub.f32 %v410_v37, %v425_v28 }
 0x3d8   :  { %v430_v44 = vadd.f32 %v428_v40, %v383_v39 }
 0x3da   :  { %v475_v47 = vadd.f32 %v473_v45, %v430_v44 }
 0x3dc   :  { %v520_v49 = vadd.f32 %v518_v48, %v475_v47 }
 0x3de   :  { %v531_v50 = vsel %vm529_vm15, %v520_v49, 0.0 }
 0x3df   :  { %v534_v51 = vrot.slane %v531_v50, 4 }
 0x3e1   :  { %v535_v52 = vadd.f32 %v534_v51, %v531_v50 }
 0x3e3   :  { %v536_v53 = vrot.slane %v535_v52, 2 }
 0x3e5   :  { %v537_v54 = vadd.f32 %v536_v53, %v535_v52 }
 0x3e7   :  { %v538_v55 = vrot.slane %v537_v54, 1 }
 0x3e9   :  { %v539_v56 = vadd.f32 %v538_v55, %v537_v54 }
 0x3eb   :  { %540 = vst [vmem:[#allocation8] sm:$0xff] %v539_v56 }
 0x3ec   :  { %807 = shalt.err (!%p804_p5)
}
 0x3ed   :  { %562 = dma.vmem_to_hbm [thread:$0]  %s560_s22, 128, %s991_s7, [#allocation9]  }
 0x3ee   :  { %820 = dma.done.wait [#allocation4], 128  }
 0x3ef   :  { %821 = vsyncadd [#allocation4], 4294967168 }
 0x3f0   :  { %822 = dma.done.wait [#allocation9], 128  }
 0x3f1   :  { %823 = vsyncadd [#allocation9], 4294967168 }
 0x3f2   :  { %569 = vsyncpa [#allocation3], 1 }
 0x3f3   :  { %570 = vsyncpa [#allocation6], 1 }
 0x3f4   :  { %571 = vsyncpa [#allocation4], 1 }
 0x3f5   :  { %572 = vsyncpa [#allocation9], 1 }

// kernel: tpu_custom_call.1
= control target key start
LH: loop header
LB: loop body
LE: loop exit
PB: predicated region body
PF: predicated region fallthrough
CT: control target
= control target key end

     0   :  { %13 = vsyncpa [#allocation3], 0  ;;  %s984_s0 = inlined_call_operand.vmem [shape: f32[16,128], index: 0, kind: input, shape index: {}]   ;;  %s985_s1 = inlined_call_operand.hbm [shape: bf16[128,128], index: 1, kind: input, shape index: {}]   ;;  %s986_s2 = inlined_call_operand.vmem [shape: f32[1,128], index: 2, kind: input, shape index: {}]   ;;  %s987_s3 = inlined_call_operand.hbm [shape: bf16[128,128], index: 3, kind: input, shape index: {}]   ;;  %s988_s4 = inlined_call_operand.vmem [shape: f32[1,128], index: 4, kind: input, shape index: {}]   ;;  %s989_s5 = inlined_call_operand.vmem [shape: s32[16,4], index: 5, kind: input, shape index: {}]   ;;  %s990_s6 = inlined_call_operand.hbm [shape: bf16[16,128], index: 6, kind: output, shape index: {0}]   ;;  %s991_s7 = inlined_call_operand.hbm [shape: f32[8,128], index: 7, kind: output, shape index: {1}]  }
   0x1   :  { %14 = vsyncpa [#allocation6], 0 }
   0x2   :  { %15 = vsyncpa [#allocation4], 0 }
   0x3   :  { %16 = vsyncpa [#allocation9], 0  ;;  %s824_s24 = smov [#allocation2]  }
   0x4   :  { %s24_s25 = sshll.u32 %s824_s24, 4  ;;  %s25_s25 = int_to_ptr.vmem [resolvable:$true] %s24_s25 }
   0x5   :  { %s744_s26 = scalar_lea.vmem %s25_s25, 1024  ;;  %p749_p1 = scmp.lt.s32.totalorder %s25_s25, %s25_s25 }
   0x6   :  { %p745_p0 = scmp.ne.s32.totalorder %s25_s25, %s744_s26  ;;  %p750_p2 = scmp.lt.s32.totalorder %s744_s26, %s744_s26 }
   0x8   :  { %p751_p3 = por %p750_p2, %p749_p1 }
   0xa   :  { %p752_p4 = pnand %p751_p3, %p745_p0 }
   0xc   :  { %755 = shalt.err (!%p752_p4)
}
   0xd   :  { %s825_s27 = smov 64   ;;  %s826_s28 = smov 4  }
   0xe   :  { %30 = dma.hbm_to_vmem [thread:$0]  %s985_s1, 1024, %s25_s25, [#allocation3], %s825_s27, %s825_s27, %s826_s28  }
   0xf   :  { %s827_s8 = smov [#allocation5]  }
  0x10   :  { %s38_s9 = sshll.u32 %s827_s8, 4  ;;  %s39_s9 = int_to_ptr.vmem [resolvable:$true] %s38_s9 }
  0x11   :  { %s764_s10 = scalar_lea.vmem %s39_s9, 1024  ;;  %p769_p6 = scmp.lt.s32.totalorder %s39_s9, %s39_s9 }
  0x12   :  { %p765_p5 = scmp.ne.s32.totalorder %s39_s9, %s764_s10  ;;  %p770_p7 = scmp.lt.s32.totalorder %s764_s10, %s764_s10 }
  0x14   :  { %p771_p8 = por %p770_p7, %p769_p6 }
  0x16   :  { %p772_p9 = pnand %p771_p8, %p765_p5 }
  0x18   :  { %775 = shalt.err (!%p772_p9)
}
  0x19   :  { %44 = dma.hbm_to_vmem [thread:$0]  %s987_s3, 1024, %s39_s9, [#allocation6], %s825_s27, %s825_s27, %s826_s28  }
  0x1a   :  { %816 = dma.done.wait [#allocation3], 1024  }
  0x1b   :  { %817 = vsyncadd [#allocation3], 4294966272 }
  0x1c   :  { %818 = dma.done.wait [#allocation6], 1024  }
  0x1d   :  { %819 = vsyncadd [#allocation6], 4294966272  ;;  %v828_v0 = vmov 0.0   ;;  %vm829_vm0 = vmmov 0   ;;  %v704_v1 = vld [vmem:[#allocation2 + $0x38] sm:$0xff]   ;;  %v705_v2 = vld [vmem:[#allocation2 + $0x30] sm:$0xff]   ;;  %v340_v41 = vlaneseq }
  0x1e   :  { %627 = vmatprep.subr.bf16.mxu0 %v828_v0  ;;  %643 = vmatprep.mubr.msk.bf16.mxu0 %vm829_vm0, %v828_v0  ;;  %v706_v3 = vld [vmem:[#allocation2 + $0x28] sm:$0xff]   ;;  %v707_v4 = vld [vmem:[#allocation2 + $0x20] sm:$0xff]   ;;  %v708_v5 = vld [vmem:[#allocation2 + $0x18] sm:$0xff]   ;;  %v830_v39 = vmov 0   ;;  %v831_v40 = vmov 1   ;;  %v832_v58 = vmov 2  }
  0x1f   :  { %647 = vmatprep.subr.bf16.mxu1 %v828_v0  ;;  %663 = vmatprep.mubr.msk.bf16.mxu1 %vm829_vm0, %v828_v0  ;;  %v709_v6 = vld [vmem:[#allocation2 + $0x10] sm:$0xff]   ;;  %v710_v7 = vld [vmem:[#allocation2 + $0x8] sm:$0xff]   ;;  %v711_v8 = vld [vmem:[#allocation2] sm:$0xff]   ;;  %v928_v42 = vand.u32 127, %v340_v41  ;;  %v833_v60 = vmov 3  }
  0x20   :  { %628 = vmatpush3.bf16.msra.mxu0 %v704_v1  ;;  %648 = vmatpush3.bf16.msra.mxu1 %v704_v1  ;;  %v73_v9 = vld [vmem:[%s984_s0] sm:$0xff]  ;;  %v74_v10 = vld [vmem:[%s984_s0 + $0x8] sm:$0xff]  ;;  %v712_v12 = vld [vmem:[#allocation5 + $0x38] sm:$0xff]  }
  0x21   :  { %629 = vmatprep.subr.bf16.mxu0 %v828_v0  ;;  %649 = vmatprep.subr.bf16.mxu1 %v828_v0  ;;  %v75_v11 = vpack.c.bf16 %v74_v10, %v73_v9  ;;  %v713_v13 = vld [vmem:[#allocation5 + $0x30] sm:$0xff]   ;;  %v714_v14 = vld [vmem:[#allocation5 + $0x28] sm:$0xff]   ;;  %v715_v15 = vld [vmem:[#allocation5 + $0x20] sm:$0xff]   ;;  %vm432_vm1 = vcmp.ge.s32.totalorder %v928_v42, 6  ;;  %vm433_vm2 = vcmp.lt.s32.totalorder %v928_v42, 9  ;;  %vm345_vm4 = vcmp.lt.s32.totalorder %v928_v42, 3 }
  0x22   :  { %v716_v16 = vld [vmem:[#allocation5 + $0x18] sm:$0xff]   ;;  %v573_v17 = vld [vmem:[%s986_s2] ss:$0 sm:$0xff]  ;;  %v717_v27 = vld [vmem:[#allocation5 + $0x10] sm:$0xff]   ;;  %699 = vset.pattern.permute.xlu1 %v830_v39  ;;  %700 = vset.pattern.permute.xlu0 %v831_v40  ;;  %vm477_vm5 = vcmp.ge.s32.totalorder %v928_v42, 9  ;;  %vm478_vm6 = vcmp.lt.s32.totalorder %v928_v42, 12 }
  0x23   :  { %v718_v28 = vld [vmem:[#allocation5 + $0x8] sm:$0xff]   ;;  %v719_v29 = vld [vmem:[#allocation5] sm:$0xff]   ;;  %vm434_vm3 = vmand %vm432_vm1, %vm433_vm2  ;;  %vm387_vm7 = vcmp.ge.s32.totalorder %v928_v42, 3  ;;  %vm388_vm8 = vcmp.lt.s32.totalorder %v928_v42, 6 }
  0x24   :  { %630 = vmatpush3.bf16.msra.mxu0 %v705_v2  ;;  %650 = vmatpush3.bf16.msra.mxu1 %v705_v2  ;;  %v582_v43 = vld [vmem:[%s988_s4] ss:$0 sm:$0xff]  ;;  %vm479_vm9 = vmand %vm477_vm5, %vm478_vm6 }
  0x25   :  { %631 = vmatprep.subr.bf16.mxu0 %v828_v0  ;;  %651 = vmatprep.subr.bf16.mxu1 %v828_v0  ;;  %vm389_vm10 = vmand %vm387_vm7, %vm388_vm8  ;;  %v342_v55 = vld [vmem:[%s989_s5] sm:$0xff]  ;;  %s834_s5 = smov [#allocation7]  }
  0x26   :  { %v457_v56 = vadd.s32 6, %v342_v55  ;;  %v412_v57 = vadd.s32 3, %v342_v55  ;;  %v502_v59 = vadd.s32 9, %v342_v55  ;;  %s546_s18 = sshll.u32 %s834_s5, 4  ;;  %s547_s18 = int_to_ptr.vmem [resolvable:$true] %s546_s18 }
  0x27   :  { %s776_s19 = scalar_lea.vmem %s547_s18, 128  ;;  %p781_p11 = scmp.lt.s32.totalorder %s547_s18, %s547_s18 }
  0x28   :  { %632 = vmatpush3.bf16.msra.mxu0 %v706_v3  ;;  %652 = vmatpush3.bf16.msra.mxu1 %v706_v3  ;;  %p777_p10 = scmp.ne.s32.totalorder %s547_s18, %s776_s19  ;;  %p782_p12 = scmp.lt.s32.totalorder %s776_s19, %s776_s19 }
  0x29   :  { %633 = vmatprep.subr.bf16.mxu0 %v828_v0  ;;  %653 = vmatprep.subr.bf16.mxu1 %v828_v0 }
  0x2a   :  { %p783_p13 = por %p782_p12, %p781_p11 }
  0x2c   :  { %634 = vmatpush3.bf16.msra.mxu0 %v707_v4  ;;  %654 = vmatpush3.bf16.msra.mxu1 %v707_v4  ;;  %p784_p0 = pnand %p783_p13, %p777_p10 }
  0x2d   :  { %635 = vmatprep.subr.bf16.mxu0 %v828_v0  ;;  %655 = vmatprep.subr.bf16.mxu1 %v828_v0 }
  0x30   :  { %636 = vmatpush3.bf16.msra.mxu0 %v708_v5  ;;  %656 = vmatpush3.bf16.msra.mxu1 %v708_v5 }
  0x31   :  { %637 = vmatprep.subr.bf16.mxu0 %v828_v0  ;;  %657 = vmatprep.subr.bf16.mxu1 %v828_v0 }
  0x34   :  { %638 = vmatpush3.bf16.msra.mxu0 %v709_v6  ;;  %658 = vmatpush3.bf16.msra.mxu1 %v709_v6 }
  0x35   :  { %639 = vmatprep.subr.bf16.mxu0 %v828_v0  ;;  %659 = vmatprep.subr.bf16.mxu1 %v828_v0 }
  0x38   :  { %640 = vmatpush3.bf16.msra.mxu0 %v710_v7  ;;  %660 = vmatpush3.bf16.msra.mxu1 %v710_v7 }
  0x39   :  { %641 = vmatprep.subr.bf16.mxu0 %v828_v0  ;;  %661 = vmatprep.subr.bf16.mxu1 %v828_v0 }
  0x3c   :  { %642 = vmatpush3.bf16.msra.mxu0 %v711_v8  ;;  %662 = vmatpush3.bf16.msra.mxu1 %v711_v8 }
  0x3d   :  { %667 = vmatprep.subr.bf16.mxu0 %v828_v0 }
  0x3f   :  { %644 = vmatmul.mubr.bf16.vlgmr.msra.gmra.mxu0 %v75_v11 }
  0x40   :  { %683 = vmatprep.mubr.msk.bf16.mxu0 %vm829_vm0, %v828_v0  ;;  %668 = vmatpush3.bf16.msra.mxu0 %v712_v12 }
  0x41   :  { %669 = vmatprep.subr.bf16.mxu0 %v828_v0 }
  0x44   :  { %670 = vmatpush3.bf16.msra.mxu0 %v713_v13 }
  0x45   :  { %671 = vmatprep.subr.bf16.mxu0 %v828_v0 }
  0x48   :  { %672 = vmatpush3.bf16.msra.mxu0 %v714_v14 }
  0x49   :  { %673 = vmatprep.subr.bf16.mxu0 %v828_v0 }
  0x4c   :  { %674 = vmatpush3.bf16.msra.mxu0 %v715_v15 }
  0x4d   :  { %675 = vmatprep.subr.bf16.mxu0 %v828_v0 }
  0x50   :  { %676 = vmatpush3.bf16.msra.mxu0 %v716_v16 }
  0x51   :  { %677 = vmatprep.subr.bf16.mxu0 %v828_v0 }
  0x54   :  { %678 = vmatpush3.bf16.msra.mxu0 %v717_v27 }
  0x55   :  { %679 = vmatprep.subr.bf16.mxu0 %v828_v0 }
  0x58   :  { %680 = vmatpush3.bf16.msra.mxu0 %v718_v28 }
  0x59   :  { %681 = vmatprep.subr.bf16.mxu0 %v828_v0 }
  0x5c   :  { %682 = vmatpush3.bf16.msra.mxu0 %v719_v29 }
  0xff   :  { %v164_v18 = vpop.f32.mrf.mxu0 }
 0x100   :  { %v165_v20 = vadd.f32 %v573_v17, %v164_v18 }
 0x101   :  { %v645_v19 = vpop.f32.mrf.mxu0 }
 0x102   :  { %v171_v24 = vmax.f32 %v165_v20, 0.0 }
 0x103   :  { %v167_v21 = vpop.f32.mrf.mxu0 }
 0x104   :  { %v168_v22 = vadd.f32 %v573_v17, %v167_v21 }
 0x105   :  { %v646_v23 = vpop.f32.mrf.mxu0 }
 0x106   :  { %v172_v25 = vmax.f32 %v168_v22, 0.0 }
 0x108   :  { %v173_v26 = vpack.c.bf16 %v172_v25, %v171_v24 }
 0x10a   :  { %664 = vmatmul.mubr.bf16.vlgmr.msra.gmra.mxu1 %v173_v26 }
 0x1ca   :  { %v208_v30 = vpop.f32.mrf.mxu1 }
 0x1cb   :  { %v209_v32 = vadd.f32 %v573_v17, %v208_v30 }
 0x1cc   :  { %v665_v31 = vpop.f32.mrf.mxu1 }
 0x1cd   :  { %v215_v36 = vmax.f32 %v209_v32, 0.0 }
 0x1ce   :  { %v211_v33 = vpop.f32.mrf.mxu1 }
 0x1cf   :  { %v212_v34 = vadd.f32 %v573_v17, %v211_v33 }
 0x1d0   :  { %v666_v35 = vpop.f32.mrf.mxu1 }
 0x1d1   :  { %v216_v37 = vmax.f32 %v212_v34, 0.0 }
 0x1d3   :  { %v217_v38 = vpack.c.bf16 %v216_v37, %v215_v36 }
 0x1d5   :  { %684 = vmatmul.mubr.bf16.vlgmr.msra.gmra.mxu0 %v217_v38 }
 0x295   :  { %v323_v44 = vpop.f32.mrf.mxu0 }
 0x296   :  { %v938_v45 = vadd.f32 %v582_v43, %v323_v44 }
 0x297   :  { %v685_v46 = vpop.f32.mrf.mxu0 }
 0x298   :  { %v435_v47 = vsel %vm434_vm3, %v938_v45, -inf  ;;  %v347_v48 = vsel %vm345_vm4, %v938_v45, -inf  ;;  %v480_v53 = vsel %vm479_vm9, %v938_v45, -inf  ;;  %v390_v54 = vsel %vm389_vm10, %v938_v45, -inf }
 0x299   :  { %437 = vmax.xlane.f32.xlu1 %v435_v47  ;;  %349 = vmax.xlane.f32.xlu0 %v347_v48  ;;  %v326_v49 = vpop.f32.mrf.mxu0 }
 0x29a   :  { %v327_v50 = vadd.f32 %v582_v43, %v326_v49 }
 0x29b   :  { %v686_v51 = vpop.f32.mrf.mxu0 }
 0x29c   :  { %v598_v52 = vpack.c.bf16 %v327_v50, %v938_v45 }
 0x29d   :  { %482 = vmax.xlane.f32.xlu1 %v480_v53  ;;  %392 = vmax.xlane.f32.xlu0 %v390_v54 }
 0x29e   :  { %599 = vst [vmem:[#allocation7] sm:$0xff] %v598_v52  }
 0x2ae   :  { %370 = vperm.xlu1 %699, %v342_v55  }
 0x2b2   :  { %701 = vset.pattern.permute.xlu1 %v832_v58 }
 0x2b3   :  { %460 = vperm.xlu1 %701, %v457_v56   ;;  %415 = vperm.xlu0 %700, %v412_v57  }
 0x2b7   :  { %702 = vset.pattern.permute.xlu1 %v833_v60  ;;  %703 = vset.pattern.permute.xlu0 %v833_v60 }
 0x2b8   :  { %505 = vperm.xlu1 %702, %v502_v59  }
 0x322   :  { %v950_v61 = vpop.xlane.xlu1 %437  ;;  %v952_v62 = vpop.xlane.xlu0 %349 }
 0x323   :  { %v441_v63 = vsub.f32 %v435_v47, %v950_v61  ;;  %v353_v0 = vsub.f32 %v347_v48, %v952_v62 }
 0x325   :  { %v443_v1 = vmul.f32 1.442695, %v441_v63  ;;  %v355_v2 = vmul.f32 1.442695, %v353_v0 }
 0x326   :  { %v956_v3 = vpop.xlane.xlu1 %482  ;;  %v958_v4 = vpop.xlane.xlu0 %392 }
 0x327   :  { %720 = vpow2.f32 %v443_v1  ;;  %v486_v5 = vsub.f32 %v480_v53, %v956_v3  ;;  %v396_v6 = vsub.f32 %v390_v54, %v958_v4 }
 0x328   :  { %722 = vpow2.f32 %v355_v2 }
 0x329   :  { %v488_v7 = vmul.f32 1.442695, %v486_v5  ;;  %v398_v8 = vmul.f32 1.442695, %v396_v6 }
 0x32a   :  { %v371_v9 = vpop.permute.xlu1 %370 }
 0x32b   :  { %724 = vpow2.f32 %v488_v7  ;;  %vm375_vm11 = vcmp.eq.s32.totalorder %v928_v42, %v371_v9 }
 0x32c   :  { %726 = vpow2.f32 %v398_v8  ;;  %v377_v10 = vsel %vm375_vm11, %v938_v45, 0.0 }
 0x32d   :  { %379 = vadd.xlane.f32.xlu1 %v377_v10 }
 0x32e   :  { %v416_v13 = vpop.permute.xlu0 %415  ;;  %v461_v15 = vpop.permute.xlu1 %460 }
 0x32f   :  { %vm420_vm12 = vcmp.eq.s32.totalorder %v928_v42, %v416_v13  ;;  %vm465_vm13 = vcmp.eq.s32.totalorder %v928_v42, %v461_v15 }
 0x330   :  { %v422_v17 = vsel %vm420_vm12, %v938_v45, 0.0  ;;  %v467_v19 = vsel %vm465_vm13, %v938_v45, 0.0 }
 0x333   :  { %v506_v18 = vpop.permute.xlu1 %505 }
 0x334   :  { %v721_v11 = vpop.eup %720  ;;  %vm510_vm14 = vcmp.eq.s32.totalorder %v928_v42, %v506_v18 }
 0x335   :  { %v723_v12 = vpop.eup %722  ;;  %447 = vadd.xlane.f32.xlu1 %v721_v11  ;;  %v512_v20 = vsel %vm510_vm14, %v938_v45, 0.0 }
 0x336   :  { %359 = vadd.xlane.f32.xlu0 %v723_v12 }
 0x338   :  { %v725_v14 = vpop.eup %724 }
 0x339   :  { %v727_v16 = vpop.eup %726  ;;  %492 = vadd.xlane.f32.xlu1 %v725_v14 }
 0x33a   :  { %402 = vadd.xlane.f32.xlu0 %v727_v16 }
 0x33d   :  { %424 = vadd.xlane.f32.xlu1 %v422_v17 }
 0x341   :  { %469 = vadd.xlane.f32.xlu1 %v467_v19 }
 0x345   :  { %514 = vadd.xlane.f32.xlu1 %v512_v20 }
 0x346   :  { %787 = shalt.err (!%p784_p0)
}
 0x347   :  { %552 = dma.vmem_to_hbm [thread:$0]  %s547_s18, 128, %s990_s6, [#allocation4], %s825_s27, %s825_s27, %s826_s28   ;;  %v524_v43 = vshrl.u32 %v340_v41, 7 }
 0x348   :  { %s835_s6 = smov [#allocation8]  }
 0x349   :  { %vm529_vm15 = vcmp.lt.s32.totalorder %v524_v43, 2  ;;  %s559_s22 = sshll.u32 %s835_s6, 4  ;;  %s560_s22 = int_to_ptr.vmem [resolvable:$true] %s559_s22 }
 0x34a   :  { %s796_s23 = scalar_lea.vmem %s560_s22, 128  ;;  %p801_p2 = scmp.lt.s32.totalorder %s560_s22, %s560_s22 }
 0x34b   :  { %p797_p1 = scmp.ne.s32.totalorder %s560_s22, %s796_s23  ;;  %p802_p3 = scmp.lt.s32.totalorder %s796_s23, %s796_s23 }
 0x34d   :  { %p803_p4 = por %p802_p3, %p801_p2 }
 0x34f   :  { %p804_p5 = pnand %p803_p4, %p797_p1 }
 0x3b6   :  { %v380_v21 = vpop.xlane.xlu1 %379 }
 0x3be   :  { %v448_v22 = vpop.xlane.xlu1 %447 }
 0x3bf   :  { %728 = vlog2.f32 %v448_v22  ;;  %v360_v23 = vpop.xlane.xlu0 %359 }
 0x3c0   :  { %730 = vlog2.f32 %v360_v23 }
 0x3c2   :  { %v493_v24 = vpop.xlane.xlu1 %492 }
 0x3c3   :  { %732 = vlog2.f32 %v493_v24  ;;  %v403_v25 = vpop.xlane.xlu0 %402 }
 0x3c4   :  { %734 = vlog2.f32 %v403_v25 }
 0x3c6   :  { %v425_v28 = vpop.xlane.xlu1 %424 }
 0x3ca   :  { %v470_v36 = vpop.xlane.xlu1 %469 }
 0x3cc   :  { %v729_v26 = vpop.eup %728 }
 0x3cd   :  { %v731_v27 = vpop.eup %730  ;;  %v452_v31 = vmul.f32 0.6931472, %v729_v26 }
 0x3ce   :  { %v364_v29 = vmul.f32 0.6931472, %v731_v27  ;;  %v515_v46 = vpop.xlane.xlu1 %514 }
 0x3cf   :  { %v455_v38 = vadd.f32 %v452_v31, %v950_v61 }
 0x3d0   :  { %v733_v30 = vpop.eup %732  ;;  %v367_v33 = vadd.f32 %v364_v29, %v952_v62 }
 0x3d1   :  { %v735_v32 = vpop.eup %734  ;;  %v497_v34 = vmul.f32 0.6931472, %v733_v30  ;;  %v473_v45 = vsub.f32 %v455_v38, %v470_v36 }
 0x3d2   :  { %v407_v35 = vmul.f32 0.6931472, %v735_v32  ;;  %v383_v39 = vsub.f32 %v367_v33, %v380_v21 }
 0x3d3   :  { %v500_v42 = vadd.f32 %v497_v34, %v956_v3 }
 0x3d4   :  { %v410_v37 = vadd.f32 %v407_v35, %v958_v4 }
 0x3d5   :  { %v518_v48 = vsub.f32 %v500_v42, %v515_v46 }
 0x3d6   :  { %v428_v40 = vsub.f32 %v410_v37, %v425_v28 }
 0x3d8   :  { %v430_v44 = vadd.f32 %v428_v40, %v383_v39 }
 0x3da   :  { %v475_v47 = vadd.f32 %v473_v45, %v430_v44 }
 0x3dc   :  { %v520_v49 = vadd.f32 %v518_v48, %v475_v47 }
 0x3de   :  { %v531_v50 = vsel %vm529_vm15, %v520_v49, 0.0 }
 0x3df   :  { %v534_v51 = vrot.slane %v531_v50, 4 }
 0x3e1   :  { %v535_v52 = vadd.f32 %v534_v51, %v531_v50 }
 0x3e3   :  { %v536_v53 = vrot.slane %v535_v52, 2 }
 0x3e5   :  { %v537_v54 = vadd.f32 %v536_v53, %v535_v52 }
 0x3e7   :  { %v538_v55 = vrot.slane %v537_v54, 1 }
 0x3e9   :  { %v539_v56 = vadd.f32 %v538_v55, %v537_v54 }
 0x3eb   :  { %540 = vst [vmem:[#allocation8] sm:$0xff] %v539_v56 }
 0x3ec   :  { %807 = shalt.err (!%p804_p5)
}
 0x3ed   :  { %562 = dma.vmem_to_hbm [thread:$0]  %s560_s22, 128, %s991_s7, [#allocation9]  }
 0x3ee   :  { %820 = dma.done.wait [#allocation4], 128  }
 0x3ef   :  { %821 = vsyncadd [#allocation4], 4294967168 }
 0x3f0   :  { %822 = dma.done.wait [#allocation9], 128  }
 0x3f1   :  { %823 = vsyncadd [#allocation9], 4294967168 }
 0x3f2   :  { %569 = vsyncpa [#allocation3], 1 }
 0x3f3   :  { %570 = vsyncpa [#allocation6], 1 }
 0x3f4   :  { %571 = vsyncpa [#allocation4], 1 }
 0x3f5   :  { %572 = vsyncpa [#allocation9], 1 }

</bundles_post_ra>
